<compile_context>
chip_gen: v7x
topology: tpu7x:2x2x1
jax: 0.10.0
libtpu: 0.0.40
codegen_flags: <defaults>
</compile_context>

<pallas_src>
import functools

import jax
import jax.numpy as jnp
from jax import lax
from jax.experimental import pallas as pl
from jax.experimental.pallas import tpu as pltpu

BN_EPS = 1e-5


# ----------------------------------------------------------------------------
# Fused Pallas kernel: whole residual block for one batch element.
# ----------------------------------------------------------------------------
def _resblock_kernel(*refs, H, W, Cin, Cout, projection):
    if projection:
        (x_ref, w1_ref, b1_ref, w2_ref, b2_ref, wsc_ref, bsc_ref,
         out_ref, xp_ref, hp_ref) = refs
    else:
        (x_ref, w1_ref, b1_ref, w2_ref, b2_ref,
         out_ref, xp_ref, hp_ref) = refs

    M = H * W
    x = x_ref[0]                                    # (H, W, Cin), VMEM-resident

    # ---- conv1 (3x3, pad=1, bias=False) + folded BN1 + ReLU ---------------
    xp_ref[...] = jnp.zeros(xp_ref.shape, xp_ref.dtype)    # zero-padded copy
    xp_ref[1:1 + H, 1:1 + W, :] = x
    acc = jnp.zeros((M, Cout), jnp.float32)
    for t in range(9):                               # 9 accumulated MXU matmuls
        di, dj = t // 3, t % 3
        patch = xp_ref[di:di + H, dj:dj + W, :].reshape(M, Cin)
        acc = acc + jnp.dot(patch, w1_ref[t],
                            preferred_element_type=jnp.float32)
    h = jnp.maximum(acc + b1_ref[...], 0.0)          # (M, Cout)

    # ---- conv2 (3x3, pad=1, bias=False) + folded BN2 -----------------------
    hp_ref[...] = jnp.zeros(hp_ref.shape, hp_ref.dtype)
    hp_ref[1:1 + H, 1:1 + W, :] = h.reshape(H, W, Cout)
    acc2 = jnp.zeros((M, Cout), jnp.float32)
    for t in range(9):
        di, dj = t // 3, t % 3
        patch = hp_ref[di:di + H, dj:dj + W, :].reshape(M, Cout)
        acc2 = acc2 + jnp.dot(patch, w2_ref[t],
                              preferred_element_type=jnp.float32)
    y = acc2 + b2_ref[...]

    # ---- shortcut + residual add + final ReLU ------------------------------
    if projection:      # 1x1 conv + folded BN shortcut (in-kernel, no HBM trip)
        res = jnp.dot(x.reshape(M, Cin), wsc_ref[...],
                      preferred_element_type=jnp.float32) + bsc_ref[...]
    else:               # identity shortcut (Cin == Cout)
        res = x.reshape(M, Cin)
    out = jnp.maximum(y + res, 0.0)
    out_ref[...] = out.reshape(1, H, W, Cout)


# ----------------------------------------------------------------------------
# Wrapper: one pallas_call for the whole block, batch on a "parallel" grid axis.
# ----------------------------------------------------------------------------
def residual_block(x, params, *, stride=1, interpret=False):
    """x: (B, H, W, Cin) NHWC float32 -> (B, H, W, Cout) float32."""
    if stride != 1:
        # TODO(synk): strided conv path not implemented in the Pallas kernel.
        raise NotImplementedError("stride != 1 is not supported")

    B, H, W, Cin = x.shape
    w1 = params["w1"]                                # (3, 3, Cin, Cout) folded
    Cout = w1.shape[-1]
    projection = "w_sc" in params
    if not projection and Cin != Cout:
        raise ValueError("identity shortcut requires Cin == Cout")

    w1f = w1.reshape(9, Cin, Cout).astype(jnp.float32)
    w2f = params["w2"].reshape(9, Cout, Cout).astype(jnp.float32)
    b1 = params["b1"].reshape(1, Cout).astype(jnp.float32)
    b2 = params["b2"].reshape(1, Cout).astype(jnp.float32)

    inputs = [x.astype(jnp.float32), w1f, b1, w2f, b2]
    in_specs = [
        pl.BlockSpec((1, H, W, Cin), lambda b: (b, 0, 0, 0)),
        pl.BlockSpec((9, Cin, Cout), lambda b: (0, 0, 0)),
        pl.BlockSpec((1, Cout), lambda b: (0, 0)),
        pl.BlockSpec((9, Cout, Cout), lambda b: (0, 0, 0)),
        pl.BlockSpec((1, Cout), lambda b: (0, 0)),
    ]
    if projection:
        wsc = params["w_sc"].reshape(Cin, Cout).astype(jnp.float32)
        bsc = params["b_sc"].reshape(1, Cout).astype(jnp.float32)
        inputs += [wsc, bsc]
        in_specs += [
            pl.BlockSpec((Cin, Cout), lambda b: (0, 0)),
            pl.BlockSpec((1, Cout), lambda b: (0, 0)),
        ]

    kernel = functools.partial(_resblock_kernel, H=H, W=W,
                               Cin=Cin, Cout=Cout, projection=projection)
    return pl.pallas_call(
        kernel,
        out_shape=jax.ShapeDtypeStruct((B, H, W, Cout), jnp.float32),
        grid=(B,),
        in_specs=in_specs,
        out_specs=pl.BlockSpec((1, H, W, Cout), lambda b: (b, 0, 0, 0)),
        scratch_shapes=[
            pltpu.VMEM((H + 2, W + 2, Cin), jnp.float32),   # padded input
            pltpu.VMEM((H + 2, W + 2, Cout), jnp.float32),  # padded hidden
        ],
        compiler_params=pltpu.CompilerParams(
            dimension_semantics=("parallel",)),
        interpret=interpret,
    )(*inputs)


# ----------------------------------------------------------------------------
# Parameter construction: raw (conv + BN running stats) and BN-folded versions.
# ----------------------------------------------------------------------------
def _fold_bn(w, gamma, beta, mean, var):
    scale = gamma / jnp.sqrt(var + BN_EPS)      # (Cout,)
    return w * scale, beta - mean * scale       # broadcast over last (out) dim


def init_raw_params(key, cin, cout, projection):
    ks = iter(jax.random.split(key, 8))

    def conv_w(k, kh, kw, ci, co):
        return jax.random.normal(k, (kh, kw, ci, co), jnp.float32) / jnp.sqrt(
            float(kh * kw * ci))

    def bn_stats(k, n):
        k1, k2, k3, k4 = jax.random.split(k, 4)
        gamma = 0.5 + jax.random.uniform(k1, (n,), jnp.float32)
        beta = 0.1 * jax.random.normal(k2, (n,), jnp.float32)
        mean = 0.1 * jax.random.normal(k3, (n,), jnp.float32)
        var = 0.5 + jax.random.uniform(k4, (n,), jnp.float32)
        return gamma, beta, mean, var

    raw = {
        "w1": conv_w(next(ks), 3, 3, cin, cout),
        "bn1": bn_stats(next(ks), cout),
        "w2": conv_w(next(ks), 3, 3, cout, cout),
        "bn2": bn_stats(next(ks), cout),
    }
    if projection:
        raw["w_sc"] = conv_w(next(ks), 1, 1, cin, cout)
        raw["bn_sc"] = bn_stats(next(ks), cout)
    return raw


def fold_params(raw):
    p = {}
    p["w1"], p["b1"] = _fold_bn(raw["w1"], *raw["bn1"])
    p["w2"], p["b2"] = _fold_bn(raw["w2"], *raw["bn2"])
    if "w_sc" in raw:
        wsc, bsc = _fold_bn(raw["w_sc"], *raw["bn_sc"])
        p["w_sc"] = wsc.reshape(wsc.shape[2], wsc.shape[3])   # (Cin, Cout)
        p["b_sc"] = bsc
    return p


# ----------------------------------------------------------------------------
# Plain-JAX reference (matches the PyTorch module in eval mode).
# ----------------------------------------------------------------------------
def reference_block(x, raw):
    def conv(x, w, pad):
        return lax.conv_general_dilated(
            x, w, window_strides=(1, 1),
            padding=[(pad, pad), (pad, pad)],
            dimension_numbers=("NHWC", "HWIO", "NHWC"),
            precision=lax.Precision.HIGHEST)

    def bn(x, stats):
        g, b, m, v = stats
        return (x - m) / jnp.sqrt(v + BN_EPS) * g + b

    h = jax.nn.relu(bn(conv(x, raw["w1"], 1), raw["bn1"]))
    y = bn(conv(h, raw["w2"], 1), raw["bn2"])
    if "w_sc" in raw:
        sc = bn(conv(x, raw["w_sc"], 0), raw["bn_sc"])
    else:
        sc = x
    return jax.nn.relu(y + sc)


# ----------------------------------------------------------------------------
if __name__ == "__main__":
    key = jax.random.PRNGKey(0)
    k_id, k_proj, k_x1, k_x2 = jax.random.split(key, 4)

    B, H, W = 2, 8, 8

    # Case 1: identity shortcut (inchannel == outchannel, stride=1).
    C = 32
    raw_id = init_raw_params(k_id, C, C, projection=False)
    x1 = jax.random.normal(k_x1, (B, H, W, C), jnp.float32)
    out1 = jax.jit(residual_block)(x1, fold_params(raw_id))
    ref1 = reference_block(x1, raw_id)

    # Case 2: projection shortcut (inchannel != outchannel -> 1x1 conv + BN).
    Cin, Cout = 16, 32
    raw_pr = init_raw_params(k_proj, Cin, Cout, projection=True)
    x2 = jax.random.normal(k_x2, (B, H, W, Cin), jnp.float32)
    out2 = jax.jit(residual_block)(x2, fold_params(raw_pr))
    ref2 = reference_block(x2, raw_pr)

    jax.block_until_ready((out1, out2))

    assert out1.shape == (B, H, W, C)
    assert out2.shape == (B, H, W, Cout)
    err1 = float(jnp.max(jnp.abs(out1 - ref1)))
    err2 = float(jnp.max(jnp.abs(out2 - ref2)))
    assert err1 < 5e-2, f"identity-shortcut block mismatch: max_err={err1}"
    assert err2 < 5e-2, f"projection-shortcut block mismatch: max_err={err2}"

    print("KERNEL_OK")
</pallas_src>

<mosaic_0001>
module attributes {stable_mosaic.version = 11 : i64} {
  func.func @_resblock_kernel(%arg0: i32, %arg1: memref<1x8x8x32xf32, #tpu.memory_space<vmem>>, %arg2: memref<9x32x32xf32, #tpu.memory_space<vmem>>, %arg3: memref<1x32xf32, #tpu.memory_space<vmem>>, %arg4: memref<9x32x32xf32, #tpu.memory_space<vmem>>, %arg5: memref<1x32xf32, #tpu.memory_space<vmem>>, %arg6: memref<1x8x8x32xf32, #tpu.memory_space<vmem>>, %arg7: memref<10x10x32xf32, #tpu.memory_space<vmem>>, %arg8: memref<10x10x32xf32, #tpu.memory_space<vmem>>) attributes {dimension_semantics = [#tpu.dimension_semantics<parallel>], iteration_bounds = array<i64: 2>, scalar_prefetch = 0 : i64, scratch_operands = 2 : i64, tpu.core_type = #tpu.core_type<tc>, window_params = [{transform_indices = @transform_0, window_bounds = array<i64: 1, 8, 8, 32>}, {pipeline_mode = #tpu.pipeline_mode<synchronous>, transform_indices = @transform_1, window_bounds = array<i64: 9, 32, 32>}, {pipeline_mode = #tpu.pipeline_mode<synchronous>, transform_indices = @transform_2, window_bounds = array<i64: 1, 32>}, {pipeline_mode = #tpu.pipeline_mode<synchronous>, transform_indices = @transform_3, window_bounds = array<i64: 9, 32, 32>}, {pipeline_mode = #tpu.pipeline_mode<synchronous>, transform_indices = @transform_4, window_bounds = array<i64: 1, 32>}, {transform_indices = @transform_5, window_bounds = array<i64: 1, 8, 8, 32>}]} {
    %c0 = arith.constant 0 : index
    %c0_0 = arith.constant 0 : index
    %c0_1 = arith.constant 0 : index
    %c0_2 = arith.constant 0 : index
    %0 = vector.load %arg1[%c0, %c0_0, %c0_1, %c0_2] : memref<1x8x8x32xf32, #tpu.memory_space<vmem>>, vector<1x8x8x32xf32>
    %1 = vector.shape_cast %0 : vector<1x8x8x32xf32> to vector<8x8x32xf32>
    %cst = arith.constant 0.000000e+00 : f32
    %2 = vector.broadcast %cst : f32 to vector<10x10x32xf32>
    %c0_3 = arith.constant 0 : index
    %c0_4 = arith.constant 0 : index
    %c0_5 = arith.constant 0 : index
    %3 = vector.load %arg7[%c0_3, %c0_4, %c0_5] : memref<10x10x32xf32, #tpu.memory_space<vmem>>, vector<10x10x32xf32>
    tpu.vector_store %arg7[%c0_3, %c0_4, %c0_5], %2 {strides = array<i32>} : memref<10x10x32xf32, #tpu.memory_space<vmem>>, vector<10x10x32xf32>,
    %c1 = arith.constant 1 : index
    %c1_6 = arith.constant 1 : index
    %c0_7 = arith.constant 0 : index
    %4 = vector.load %arg7[%c1, %c1_6, %c0_7] : memref<10x10x32xf32, #tpu.memory_space<vmem>>, vector<8x8x32xf32>
    tpu.vector_store %arg7[%c1, %c1_6, %c0_7], %1 {strides = array<i32>} : memref<10x10x32xf32, #tpu.memory_space<vmem>>, vector<8x8x32xf32>,
    %cst_8 = arith.constant 0.000000e+00 : f32
    %5 = vector.broadcast %cst_8 : f32 to vector<64x32xf32>
    %c0_9 = arith.constant 0 : index
    %c0_10 = arith.constant 0 : index
    %c0_11 = arith.constant 0 : index
    %6 = vector.load %arg7[%c0_9, %c0_10, %c0_11] : memref<10x10x32xf32, #tpu.memory_space<vmem>>, vector<8x8x32xf32>
    %7 = vector.shape_cast %6 : vector<8x8x32xf32> to vector<64x32xf32>
    %c0_12 = arith.constant 0 : index
    %c0_13 = arith.constant 0 : index
    %c0_14 = arith.constant 0 : index
    %8 = vector.load %arg2[%c0_12, %c0_13, %c0_14] : memref<9x32x32xf32, #tpu.memory_space<vmem>>, vector<1x32x32xf32>
    %9 = vector.shape_cast %8 : vector<1x32x32xf32> to vector<32x32xf32>
    %cst_15 = arith.constant dense<0.000000e+00> : vector<64x32xf32>
    %10 = tpu.matmul %7, %9, %cst_15 {dimension_numbers = #tpu.dot_dimension_numbers<[1], [0], [0], [1], [0, 0, 1, 1], [], []>} : vector<64x32xf32>, vector<32x32xf32>, vector<64x32xf32> -> vector<64x32xf32>
    %11 = arith.addf %5, %10 : vector<64x32xf32>
    %c0_16 = arith.constant 0 : index
    %c1_17 = arith.constant 1 : index
    %c0_18 = arith.constant 0 : index
    %12 = vector.load %arg7[%c0_16, %c1_17, %c0_18] : memref<10x10x32xf32, #tpu.memory_space<vmem>>, vector<8x8x32xf32>
    %13 = vector.shape_cast %12 : vector<8x8x32xf32> to vector<64x32xf32>
    %c1_19 = arith.constant 1 : index
    %c0_20 = arith.constant 0 : index
    %c0_21 = arith.constant 0 : index
    %14 = vector.load %arg2[%c1_19, %c0_20, %c0_21] : memref<9x32x32xf32, #tpu.memory_space<vmem>>, vector<1x32x32xf32>
    %15 = vector.shape_cast %14 : vector<1x32x32xf32> to vector<32x32xf32>
    %cst_22 = arith.constant dense<0.000000e+00> : vector<64x32xf32>
    %16 = tpu.matmul %13, %15, %cst_22 {dimension_numbers = #tpu.dot_dimension_numbers<[1], [0], [0], [1], [0, 0, 1, 1], [], []>} : vector<64x32xf32>, vector<32x32xf32>, vector<64x32xf32> -> vector<64x32xf32>
    %17 = arith.addf %11, %16 : vector<64x32xf32>
    %c0_23 = arith.constant 0 : index
    %c2 = arith.constant 2 : index
    %c0_24 = arith.constant 0 : index
    %18 = vector.load %arg7[%c0_23, %c2, %c0_24] : memref<10x10x32xf32, #tpu.memory_space<vmem>>, vector<8x8x32xf32>
    %19 = vector.shape_cast %18 : vector<8x8x32xf32> to vector<64x32xf32>
    %c2_25 = arith.constant 2 : index
    %c0_26 = arith.constant 0 : index
    %c0_27 = arith.constant 0 : index
    %20 = vector.load %arg2[%c2_25, %c0_26, %c0_27] : memref<9x32x32xf32, #tpu.memory_space<vmem>>, vector<1x32x32xf32>
    %21 = vector.shape_cast %20 : vector<1x32x32xf32> to vector<32x32xf32>
    %cst_28 = arith.constant dense<0.000000e+00> : vector<64x32xf32>
    %22 = tpu.matmul %19, %21, %cst_28 {dimension_numbers = #tpu.dot_dimension_numbers<[1], [0], [0], [1], [0, 0, 1, 1], [], []>} : vector<64x32xf32>, vector<32x32xf32>, vector<64x32xf32> -> vector<64x32xf32>
    %23 = arith.addf %17, %22 : vector<64x32xf32>
    %c1_29 = arith.constant 1 : index
    %c0_30 = arith.constant 0 : index
    %c0_31 = arith.constant 0 : index
    %24 = vector.load %arg7[%c1_29, %c0_30, %c0_31] : memref<10x10x32xf32, #tpu.memory_space<vmem>>, vector<8x8x32xf32>
    %25 = vector.shape_cast %24 : vector<8x8x32xf32> to vector<64x32xf32>
    %c3 = arith.constant 3 : index
    %c0_32 = arith.constant 0 : index
    %c0_33 = arith.constant 0 : index
    %26 = vector.load %arg2[%c3, %c0_32, %c0_33] : memref<9x32x32xf32, #tpu.memory_space<vmem>>, vector<1x32x32xf32>
    %27 = vector.shape_cast %26 : vector<1x32x32xf32> to vector<32x32xf32>
    %cst_34 = arith.constant dense<0.000000e+00> : vector<64x32xf32>
    %28 = tpu.matmul %25, %27, %cst_34 {dimension_numbers = #tpu.dot_dimension_numbers<[1], [0], [0], [1], [0, 0, 1, 1], [], []>} : vector<64x32xf32>, vector<32x32xf32>, vector<64x32xf32> -> vector<64x32xf32>
    %29 = arith.addf %23, %28 : vector<64x32xf32>
    %c1_35 = arith.constant 1 : index
    %c1_36 = arith.constant 1 : index
    %c0_37 = arith.constant 0 : index
    %30 = vector.load %arg7[%c1_35, %c1_36, %c0_37] : memref<10x10x32xf32, #tpu.memory_space<vmem>>, vector<8x8x32xf32>
    %31 = vector.shape_cast %30 : vector<8x8x32xf32> to vector<64x32xf32>
    %c4 = arith.constant 4 : index
    %c0_38 = arith.constant 0 : index
    %c0_39 = arith.constant 0 : index
    %32 = vector.load %arg2[%c4, %c0_38, %c0_39] : memref<9x32x32xf32, #tpu.memory_space<vmem>>, vector<1x32x32xf32>
    %33 = vector.shape_cast %32 : vector<1x32x32xf32> to vector<32x32xf32>
    %cst_40 = arith.constant dense<0.000000e+00> : vector<64x32xf32>
    %34 = tpu.matmul %31, %33, %cst_40 {dimension_numbers = #tpu.dot_dimension_numbers<[1], [0], [0], [1], [0, 0, 1, 1], [], []>} : vector<64x32xf32>, vector<32x32xf32>, vector<64x32xf32> -> vector<64x32xf32>
    %35 = arith.addf %29, %34 : vector<64x32xf32>
    %c1_41 = arith.constant 1 : index
    %c2_42 = arith.constant 2 : index
    %c0_43 = arith.constant 0 : index
    %36 = vector.load %arg7[%c1_41, %c2_42, %c0_43] : memref<10x10x32xf32, #tpu.memory_space<vmem>>, vector<8x8x32xf32>
    %37 = vector.shape_cast %36 : vector<8x8x32xf32> to vector<64x32xf32>
    %c5 = arith.constant 5 : index
    %c0_44 = arith.constant 0 : index
    %c0_45 = arith.constant 0 : index
    %38 = vector.load %arg2[%c5, %c0_44, %c0_45] : memref<9x32x32xf32, #tpu.memory_space<vmem>>, vector<1x32x32xf32>
    %39 = vector.shape_cast %38 : vector<1x32x32xf32> to vector<32x32xf32>
    %cst_46 = arith.constant dense<0.000000e+00> : vector<64x32xf32>
    %40 = tpu.matmul %37, %39, %cst_46 {dimension_numbers = #tpu.dot_dimension_numbers<[1], [0], [0], [1], [0, 0, 1, 1], [], []>} : vector<64x32xf32>, vector<32x32xf32>, vector<64x32xf32> -> vector<64x32xf32>
    %41 = arith.addf %35, %40 : vector<64x32xf32>
    %c2_47 = arith.constant 2 : index
    %c0_48 = arith.constant 0 : index
    %c0_49 = arith.constant 0 : index
    %42 = vector.load %arg7[%c2_47, %c0_48, %c0_49] : memref<10x10x32xf32, #tpu.memory_space<vmem>>, vector<8x8x32xf32>
    %43 = vector.shape_cast %42 : vector<8x8x32xf32> to vector<64x32xf32>
    %c6 = arith.constant 6 : index
    %c0_50 = arith.constant 0 : index
    %c0_51 = arith.constant 0 : index
    %44 = vector.load %arg2[%c6, %c0_50, %c0_51] : memref<9x32x32xf32, #tpu.memory_space<vmem>>, vector<1x32x32xf32>
    %45 = vector.shape_cast %44 : vector<1x32x32xf32> to vector<32x32xf32>
    %cst_52 = arith.constant dense<0.000000e+00> : vector<64x32xf32>
    %46 = tpu.matmul %43, %45, %cst_52 {dimension_numbers = #tpu.dot_dimension_numbers<[1], [0], [0], [1], [0, 0, 1, 1], [], []>} : vector<64x32xf32>, vector<32x32xf32>, vector<64x32xf32> -> vector<64x32xf32>
    %47 = arith.addf %41, %46 : vector<64x32xf32>
    %c2_53 = arith.constant 2 : index
    %c1_54 = arith.constant 1 : index
    %c0_55 = arith.constant 0 : index
    %48 = vector.load %arg7[%c2_53, %c1_54, %c0_55] : memref<10x10x32xf32, #tpu.memory_space<vmem>>, vector<8x8x32xf32>
    %49 = vector.shape_cast %48 : vector<8x8x32xf32> to vector<64x32xf32>
    %c7 = arith.constant 7 : index
    %c0_56 = arith.constant 0 : index
    %c0_57 = arith.constant 0 : index
    %50 = vector.load %arg2[%c7, %c0_56, %c0_57] : memref<9x32x32xf32, #tpu.memory_space<vmem>>, vector<1x32x32xf32>
    %51 = vector.shape_cast %50 : vector<1x32x32xf32> to vector<32x32xf32>
    %cst_58 = arith.constant dense<0.000000e+00> : vector<64x32xf32>
    %52 = tpu.matmul %49, %51, %cst_58 {dimension_numbers = #tpu.dot_dimension_numbers<[1], [0], [0], [1], [0, 0, 1, 1], [], []>} : vector<64x32xf32>, vector<32x32xf32>, vector<64x32xf32> -> vector<64x32xf32>
    %53 = arith.addf %47, %52 : vector<64x32xf32>
    %c2_59 = arith.constant 2 : index
    %c2_60 = arith.constant 2 : index
    %c0_61 = arith.constant 0 : index
    %54 = vector.load %arg7[%c2_59, %c2_60, %c0_61] : memref<10x10x32xf32, #tpu.memory_space<vmem>>, vector<8x8x32xf32>
    %55 = vector.shape_cast %54 : vector<8x8x32xf32> to vector<64x32xf32>
    %c8 = arith.constant 8 : index
    %c0_62 = arith.constant 0 : index
    %c0_63 = arith.constant 0 : index
    %56 = vector.load %arg2[%c8, %c0_62, %c0_63] : memref<9x32x32xf32, #tpu.memory_space<vmem>>, vector<1x32x32xf32>
    %57 = vector.shape_cast %56 : vector<1x32x32xf32> to vector<32x32xf32>
    %cst_64 = arith.constant dense<0.000000e+00> : vector<64x32xf32>
    %58 = tpu.matmul %55, %57, %cst_64 {dimension_numbers = #tpu.dot_dimension_numbers<[1], [0], [0], [1], [0, 0, 1, 1], [], []>} : vector<64x32xf32>, vector<32x32xf32>, vector<64x32xf32> -> vector<64x32xf32>
    %59 = arith.addf %53, %58 : vector<64x32xf32>
    %c0_65 = arith.constant 0 : index
    %c0_66 = arith.constant 0 : index
    %60 = vector.load %arg3[%c0_65, %c0_66] : memref<1x32xf32, #tpu.memory_space<vmem>>, vector<1x32xf32>
    %61 = vector.broadcast %60 : vector<1x32xf32> to vector<64x32xf32>
    %62 = arith.addf %59, %61 : vector<64x32xf32>
    %cst_67 = arith.constant 0.000000e+00 : f32
    %63 = vector.broadcast %cst_67 : f32 to vector<64x32xf32>
    %64 = arith.maximumf %62, %63 : vector<64x32xf32>
    %cst_68 = arith.constant 0.000000e+00 : f32
    %65 = vector.broadcast %cst_68 : f32 to vector<10x10x32xf32>
    %c0_69 = arith.constant 0 : index
    %c0_70 = arith.constant 0 : index
    %c0_71 = arith.constant 0 : index
    %66 = vector.load %arg8[%c0_69, %c0_70, %c0_71] : memref<10x10x32xf32, #tpu.memory_space<vmem>>, vector<10x10x32xf32>
    tpu.vector_store %arg8[%c0_69, %c0_70, %c0_71], %65 {strides = array<i32>} : memref<10x10x32xf32, #tpu.memory_space<vmem>>, vector<10x10x32xf32>,
    %67 = vector.shape_cast %64 : vector<64x32xf32> to vector<8x8x32xf32>
    %c1_72 = arith.constant 1 : index
    %c1_73 = arith.constant 1 : index
    %c0_74 = arith.constant 0 : index
    %68 = vector.load %arg8[%c1_72, %c1_73, %c0_74] : memref<10x10x32xf32, #tpu.memory_space<vmem>>, vector<8x8x32xf32>
    tpu.vector_store %arg8[%c1_72, %c1_73, %c0_74], %67 {strides = array<i32>} : memref<10x10x32xf32, #tpu.memory_space<vmem>>, vector<8x8x32xf32>,
    %cst_75 = arith.constant 0.000000e+00 : f32
    %69 = vector.broadcast %cst_75 : f32 to vector<64x32xf32>
    %c0_76 = arith.constant 0 : index
    %c0_77 = arith.constant 0 : index
    %c0_78 = arith.constant 0 : index
    %70 = vector.load %arg8[%c0_76, %c0_77, %c0_78] : memref<10x10x32xf32, #tpu.memory_space<vmem>>, vector<8x8x32xf32>
    %71 = vector.shape_cast %70 : vector<8x8x32xf32> to vector<64x32xf32>
    %c0_79 = arith.constant 0 : index
    %c0_80 = arith.constant 0 : index
    %c0_81 = arith.constant 0 : index
    %72 = vector.load %arg4[%c0_79, %c0_80, %c0_81] : memref<9x32x32xf32, #tpu.memory_space<vmem>>, vector<1x32x32xf32>
    %73 = vector.shape_cast %72 : vector<1x32x32xf32> to vector<32x32xf32>
    %cst_82 = arith.constant dense<0.000000e+00> : vector<64x32xf32>
    %74 = tpu.matmul %71, %73, %cst_82 {dimension_numbers = #tpu.dot_dimension_numbers<[1], [0], [0], [1], [0, 0, 1, 1], [], []>} : vector<64x32xf32>, vector<32x32xf32>, vector<64x32xf32> -> vector<64x32xf32>
    %75 = arith.addf %69, %74 : vector<64x32xf32>
    %c0_83 = arith.constant 0 : index
    %c1_84 = arith.constant 1 : index
    %c0_85 = arith.constant 0 : index
    %76 = vector.load %arg8[%c0_83, %c1_84, %c0_85] : memref<10x10x32xf32, #tpu.memory_space<vmem>>, vector<8x8x32xf32>
    %77 = vector.shape_cast %76 : vector<8x8x32xf32> to vector<64x32xf32>
    %c1_86 = arith.constant 1 : index
    %c0_87 = arith.constant 0 : index
    %c0_88 = arith.constant 0 : index
    %78 = vector.load %arg4[%c1_86, %c0_87, %c0_88] : memref<9x32x32xf32, #tpu.memory_space<vmem>>, vector<1x32x32xf32>
    %79 = vector.shape_cast %78 : vector<1x32x32xf32> to vector<32x32xf32>
    %cst_89 = arith.constant dense<0.000000e+00> : vector<64x32xf32>
    %80 = tpu.matmul %77, %79, %cst_89 {dimension_numbers = #tpu.dot_dimension_numbers<[1], [0], [0], [1], [0, 0, 1, 1], [], []>} : vector<64x32xf32>, vector<32x32xf32>, vector<64x32xf32> -> vector<64x32xf32>
    %81 = arith.addf %75, %80 : vector<64x32xf32>
    %c0_90 = arith.constant 0 : index
    %c2_91 = arith.constant 2 : index
    %c0_92 = arith.constant 0 : index
    %82 = vector.load %arg8[%c0_90, %c2_91, %c0_92] : memref<10x10x32xf32, #tpu.memory_space<vmem>>, vector<8x8x32xf32>
    %83 = vector.shape_cast %82 : vector<8x8x32xf32> to vector<64x32xf32>
    %c2_93 = arith.constant 2 : index
    %c0_94 = arith.constant 0 : index
    %c0_95 = arith.constant 0 : index
    %84 = vector.load %arg4[%c2_93, %c0_94, %c0_95] : memref<9x32x32xf32, #tpu.memory_space<vmem>>, vector<1x32x32xf32>
    %85 = vector.shape_cast %84 : vector<1x32x32xf32> to vector<32x32xf32>
    %cst_96 = arith.constant dense<0.000000e+00> : vector<64x32xf32>
    %86 = tpu.matmul %83, %85, %cst_96 {dimension_numbers = #tpu.dot_dimension_numbers<[1], [0], [0], [1], [0, 0, 1, 1], [], []>} : vector<64x32xf32>, vector<32x32xf32>, vector<64x32xf32> -> vector<64x32xf32>
    %87 = arith.addf %81, %86 : vector<64x32xf32>
    %c1_97 = arith.constant 1 : index
    %c0_98 = arith.constant 0 : index
    %c0_99 = arith.constant 0 : index
    %88 = vector.load %arg8[%c1_97, %c0_98, %c0_99] : memref<10x10x32xf32, #tpu.memory_space<vmem>>, vector<8x8x32xf32>
    %89 = vector.shape_cast %88 : vector<8x8x32xf32> to vector<64x32xf32>
    %c3_100 = arith.constant 3 : index
    %c0_101 = arith.constant 0 : index
    %c0_102 = arith.constant 0 : index
    %90 = vector.load %arg4[%c3_100, %c0_101, %c0_102] : memref<9x32x32xf32, #tpu.memory_space<vmem>>, vector<1x32x32xf32>
    %91 = vector.shape_cast %90 : vector<1x32x32xf32> to vector<32x32xf32>
    %cst_103 = arith.constant dense<0.000000e+00> : vector<64x32xf32>
    %92 = tpu.matmul %89, %91, %cst_103 {dimension_numbers = #tpu.dot_dimension_numbers<[1], [0], [0], [1], [0, 0, 1, 1], [], []>} : vector<64x32xf32>, vector<32x32xf32>, vector<64x32xf32> -> vector<64x32xf32>
    %93 = arith.addf %87, %92 : vector<64x32xf32>
    %c1_104 = arith.constant 1 : index
    %c1_105 = arith.constant 1 : index
    %c0_106 = arith.constant 0 : index
    %94 = vector.load %arg8[%c1_104, %c1_105, %c0_106] : memref<10x10x32xf32, #tpu.memory_space<vmem>>, vector<8x8x32xf32>
    %95 = vector.shape_cast %94 : vector<8x8x32xf32> to vector<64x32xf32>
    %c4_107 = arith.constant 4 : index
    %c0_108 = arith.constant 0 : index
    %c0_109 = arith.constant 0 : index
    %96 = vector.load %arg4[%c4_107, %c0_108, %c0_109] : memref<9x32x32xf32, #tpu.memory_space<vmem>>, vector<1x32x32xf32>
    %97 = vector.shape_cast %96 : vector<1x32x32xf32> to vector<32x32xf32>
    %cst_110 = arith.constant dense<0.000000e+00> : vector<64x32xf32>
    %98 = tpu.matmul %95, %97, %cst_110 {dimension_numbers = #tpu.dot_dimension_numbers<[1], [0], [0], [1], [0, 0, 1, 1], [], []>} : vector<64x32xf32>, vector<32x32xf32>, vector<64x32xf32> -> vector<64x32xf32>
    %99 = arith.addf %93, %98 : vector<64x32xf32>
    %c1_111 = arith.constant 1 : index
    %c2_112 = arith.constant 2 : index
    %c0_113 = arith.constant 0 : index
    %100 = vector.load %arg8[%c1_111, %c2_112, %c0_113] : memref<10x10x32xf32, #tpu.memory_space<vmem>>, vector<8x8x32xf32>
    %101 = vector.shape_cast %100 : vector<8x8x32xf32> to vector<64x32xf32>
    %c5_114 = arith.constant 5 : index
    %c0_115 = arith.constant 0 : index
    %c0_116 = arith.constant 0 : index
    %102 = vector.load %arg4[%c5_114, %c0_115, %c0_116] : memref<9x32x32xf32, #tpu.memory_space<vmem>>, vector<1x32x32xf32>
    %103 = vector.shape_cast %102 : vector<1x32x32xf32> to vector<32x32xf32>
    %cst_117 = arith.constant dense<0.000000e+00> : vector<64x32xf32>
    %104 = tpu.matmul %101, %103, %cst_117 {dimension_numbers = #tpu.dot_dimension_numbers<[1], [0], [0], [1], [0, 0, 1, 1], [], []>} : vector<64x32xf32>, vector<32x32xf32>, vector<64x32xf32> -> vector<64x32xf32>
    %105 = arith.addf %99, %104 : vector<64x32xf32>
    %c2_118 = arith.constant 2 : index
    %c0_119 = arith.constant 0 : index
    %c0_120 = arith.constant 0 : index
    %106 = vector.load %arg8[%c2_118, %c0_119, %c0_120] : memref<10x10x32xf32, #tpu.memory_space<vmem>>, vector<8x8x32xf32>
    %107 = vector.shape_cast %106 : vector<8x8x32xf32> to vector<64x32xf32>
    %c6_121 = arith.constant 6 : index
    %c0_122 = arith.constant 0 : index
    %c0_123 = arith.constant 0 : index
    %108 = vector.load %arg4[%c6_121, %c0_122, %c0_123] : memref<9x32x32xf32, #tpu.memory_space<vmem>>, vector<1x32x32xf32>
    %109 = vector.shape_cast %108 : vector<1x32x32xf32> to vector<32x32xf32>
    %cst_124 = arith.constant dense<0.000000e+00> : vector<64x32xf32>
    %110 = tpu.matmul %107, %109, %cst_124 {dimension_numbers = #tpu.dot_dimension_numbers<[1], [0], [0], [1], [0, 0, 1, 1], [], []>} : vector<64x32xf32>, vector<32x32xf32>, vector<64x32xf32> -> vector<64x32xf32>
    %111 = arith.addf %105, %110 : vector<64x32xf32>
    %c2_125 = arith.constant 2 : index
    %c1_126 = arith.constant 1 : index
    %c0_127 = arith.constant 0 : index
    %112 = vector.load %arg8[%c2_125, %c1_126, %c0_127] : memref<10x10x32xf32, #tpu.memory_space<vmem>>, vector<8x8x32xf32>
    %113 = vector.shape_cast %112 : vector<8x8x32xf32> to vector<64x32xf32>
    %c7_128 = arith.constant 7 : index
    %c0_129 = arith.constant 0 : index
    %c0_130 = arith.constant 0 : index
    %114 = vector.load %arg4[%c7_128, %c0_129, %c0_130] : memref<9x32x32xf32, #tpu.memory_space<vmem>>, vector<1x32x32xf32>
    %115 = vector.shape_cast %114 : vector<1x32x32xf32> to vector<32x32xf32>
    %cst_131 = arith.constant dense<0.000000e+00> : vector<64x32xf32>
    %116 = tpu.matmul %113, %115, %cst_131 {dimension_numbers = #tpu.dot_dimension_numbers<[1], [0], [0], [1], [0, 0, 1, 1], [], []>} : vector<64x32xf32>, vector<32x32xf32>, vector<64x32xf32> -> vector<64x32xf32>
    %117 = arith.addf %111, %116 : vector<64x32xf32>
    %c2_132 = arith.constant 2 : index
    %c2_133 = arith.constant 2 : index
    %c0_134 = arith.constant 0 : index
    %118 = vector.load %arg8[%c2_132, %c2_133, %c0_134] : memref<10x10x32xf32, #tpu.memory_space<vmem>>, vector<8x8x32xf32>
    %119 = vector.shape_cast %118 : vector<8x8x32xf32> to vector<64x32xf32>
    %c8_135 = arith.constant 8 : index
    %c0_136 = arith.constant 0 : index
    %c0_137 = arith.constant 0 : index
    %120 = vector.load %arg4[%c8_135, %c0_136, %c0_137] : memref<9x32x32xf32, #tpu.memory_space<vmem>>, vector<1x32x32xf32>
    %121 = vector.shape_cast %120 : vector<1x32x32xf32> to vector<32x32xf32>
    %cst_138 = arith.constant dense<0.000000e+00> : vector<64x32xf32>
    %122 = tpu.matmul %119, %121, %cst_138 {dimension_numbers = #tpu.dot_dimension_numbers<[1], [0], [0], [1], [0, 0, 1, 1], [], []>} : vector<64x32xf32>, vector<32x32xf32>, vector<64x32xf32> -> vector<64x32xf32>
    %123 = arith.addf %117, %122 : vector<64x32xf32>
    %c0_139 = arith.constant 0 : index
    %c0_140 = arith.constant 0 : index
    %124 = vector.load %arg5[%c0_139, %c0_140] : memref<1x32xf32, #tpu.memory_space<vmem>>, vector<1x32xf32>
    %125 = vector.broadcast %124 : vector<1x32xf32> to vector<64x32xf32>
    %126 = arith.addf %123, %125 : vector<64x32xf32>
    %127 = vector.shape_cast %1 : vector<8x8x32xf32> to vector<64x32xf32>
    %128 = arith.addf %126, %127 : vector<64x32xf32>
    %cst_141 = arith.constant 0.000000e+00 : f32
    %129 = vector.broadcast %cst_141 : f32 to vector<64x32xf32>
    %130 = arith.maximumf %128, %129 : vector<64x32xf32>
    %131 = vector.shape_cast %130 : vector<64x32xf32> to vector<1x8x8x32xf32>
    %c0_142 = arith.constant 0 : index
    %c0_143 = arith.constant 0 : index
    %c0_144 = arith.constant 0 : index
    %c0_145 = arith.constant 0 : index
    %132 = vector.load %arg6[%c0_142, %c0_143, %c0_144, %c0_145] : memref<1x8x8x32xf32, #tpu.memory_space<vmem>>, vector<1x8x8x32xf32>
    tpu.vector_store %arg6[%c0_142, %c0_143, %c0_144, %c0_145], %131 {strides = array<i32>} : memref<1x8x8x32xf32, #tpu.memory_space<vmem>>, vector<1x8x8x32xf32>,
    return
  }
  func.func @transform_0(%arg0: i32) -> (i32, i32, i32, i32) {
    %c0_i32 = arith.constant 0 : i32
    %c0_i32_0 = arith.constant 0 : i32
    %c0_i32_1 = arith.constant 0 : i32
    %c0_i32_2 = arith.constant 0 : i32
    return %arg0, %c0_i32, %c0_i32_0, %c0_i32_1 : i32, i32, i32, i32
  }
  func.func @transform_1(%arg0: i32) -> (i32, i32, i32) {
    %c0_i32 = arith.constant 0 : i32
    %c0_i32_0 = arith.constant 0 : i32
    %c0_i32_1 = arith.constant 0 : i32
    %c0_i32_2 = arith.constant 0 : i32
    return %c0_i32, %c0_i32_0, %c0_i32_1 : i32, i32, i32
  }
  func.func @transform_2(%arg0: i32) -> (i32, i32) {
    %c0_i32 = arith.constant 0 : i32
    %c0_i32_0 = arith.constant 0 : i32
    %c0_i32_1 = arith.constant 0 : i32
    return %c0_i32, %c0_i32_0 : i32, i32
  }
  func.func @transform_3(%arg0: i32) -> (i32, i32, i32) {
    %c0_i32 = arith.constant 0 : i32
    %c0_i32_0 = arith.constant 0 : i32
    %c0_i32_1 = arith.constant 0 : i32
    %c0_i32_2 = arith.constant 0 : i32
    return %c0_i32, %c0_i32_0, %c0_i32_1 : i32, i32, i32
  }
  func.func @transform_4(%arg0: i32) -> (i32, i32) {
    %c0_i32 = arith.constant 0 : i32
    %c0_i32_0 = arith.constant 0 : i32
    %c0_i32_1 = arith.constant 0 : i32
    return %c0_i32, %c0_i32_0 : i32, i32
  }
  func.func @transform_5(%arg0: i32) -> (i32, i32, i32, i32) {
    %c0_i32 = arith.constant 0 : i32
    %c0_i32_0 = arith.constant 0 : i32
    %c0_i32_1 = arith.constant 0 : i32
    %c0_i32_2 = arith.constant 0 : i32
    return %arg0, %c0_i32, %c0_i32_0, %c0_i32_1 : i32, i32, i32, i32
  }
}

</mosaic_0001>

<bundles_post_ra>
// kernel: residual_block.1
= control target key start
LH: loop header
LB: loop body
LE: loop exit
PB: predicated region body
PF: predicated region fallthrough
CT: control target
= control target key end

     0   :  { %10 = vsyncpa [#allocation5], 0  ;;  %s5161_s0 = inlined_call_operand.hbm [shape: f32[2,8,8,32], index: 0, kind: input, shape index: {}]   ;;  %s5162_s1 = inlined_call_operand.hbm [shape: f32[9,32,32], index: 1, kind: input, shape index: {}]   ;;  %s5163_s2 = inlined_call_operand.vmem [shape: f32[1,32], index: 2, kind: input, shape index: {}]   ;;  %s5164_s3 = inlined_call_operand.hbm [shape: f32[9,32,32], index: 3, kind: input, shape index: {}]   ;;  %s5165_s4 = inlined_call_operand.vmem [shape: f32[1,32], index: 4, kind: input, shape index: {}]   ;;  %s5166_s5 = inlined_call_operand.hbm [shape: f32[2,8,8,32], index: 5, kind: output, shape index: {}]  }
   0x1   :  { %12 = vsyncpa [#allocation5 + $0x1], 0 }
   0x2   :  { %13 = vsyncpa [#allocation8], 0 }
   0x3   :  { %14 = vsyncpa [#allocation6], 0 }
   0x4   :  { %16 = vsyncpa [#allocation6 + $0x1], 0  ;;  %s4459_s18 = smov 0   ;;  %s4461_s19 = smov 0  }
   0x5   :  { %s4463_s20 = smov 0   ;;  %s4465_s21 = smov 0  }
   0x6 LB: > { %s4480_s22 = sadd.s32 4294967295, %s4418_s21   ;;  %s3176_s23 = sadd.s32 4294967294, %s4418_s21   ;;  %s4418_s21 = sphi %s4465_s21, %s5186_s21   ;;  %s4414_s20 = sphi %s4463_s20, %s5185_s20   ;;  %s4410_s19 = sphi %s4461_s19, %s5184_s19   ;;  %s4406_s18 = sphi %s4459_s18, %s5183_s18  }
   0x7   : > { %p42_p0 = scmp.ne.s32.totalorder %s4410_s19, %s4406_s18  ;;  %p5167_p1 = scmp.eq.s32.totalorder %s4480_s22, 0 }
   0x8   : > { %p156_p3 = scmp.eq.s32.totalorder %s3176_s23, 1  ;;  %p3177_p5 = scmp.ge.s32.totalorder %s4418_s21, 1 }
   0x9   : > { %p4489_p4 = por %p5167_p1, %p42_p0  ;;  %p163_p7 = scmp.lt.s32.totalorder %s4418_s21, 3 }
   0xa   : > { %p4494_p6 = por %p156_p3, %p42_p0  ;;  %s4420_s27 = smov [#allocation7]  }
   0xb   : > { %s5170_s24 = scalar_select %p4489_p4, 1, 0 }
   0xc   : > { %s5171_s25 = scalar_select %p4494_p6, 1, 0 }
   0xd   : > { %p4499_p8 = pnand %p3177_p5, %p163_p7  ;;  %s175_s28 = sshll.u32 %s4420_s27, 4  ;;  %s4503_s28 = int_to_ptr.vmem [resolvable:$true] %s175_s28 }
   0xe   : > { %s4421_s30 = smov [#allocation9]   ;;  %s4262_s9 = scalar_lea.hbm %s5162_s1, 4608 }
   0xf   : > { %p4202_p9 = pneg %p4499_p8  ;;  %s191_s6 = sshll.u32 %s4421_s30, 4  ;;  %s4514_s6 = int_to_ptr.vmem [resolvable:$true] %s191_s6 }
  0x10   : > { %p4263_p12 = scmp.ne.s32.totalorder %s5162_s1, %s4262_s9  ;;  %p4269_p5 = scmp.lt.u32.totalorder %s4262_s9, %s5162_s1 }
  0x11   : > { %p4510_p11 = pnand %p4202_p9, %p5167_p1 }
  0x13   : > { %p4264_p13 = pneg %p4510_p11 }
  0x15   : > { %p4265_p0 = pnand %p4264_p13, %p4263_p12 }
  0x17   : > { %p4266_p3 = pneg %p4265_p0 }
  0x19   : > { %p4271_p7 = pnand %p4269_p5, %p4266_p3 }
  0x1b   : > { %4274 = shalt.err (!%p4271_p7)
}
  0x1c   : > { %s4275_s14 = scalar_lea.vmem %s4503_s28, 4608  ;;  %p4283_p2 = scmp.lt.s32.totalorder %s4503_s28, %s4503_s28 }
  0x1d   : > { %p4276_p9 = scmp.ne.s32.totalorder %s4503_s28, %s4275_s14  ;;  %p4284_p12 = scmp.lt.s32.totalorder %s4275_s14, %s4275_s14 }
  0x1f   : > { %p4278_p10 = pnand %p4276_p9, %p4264_p13  ;;  %p4285_p0 = por %p4284_p12, %p4283_p2 }
  0x21   : > { %p4279_p1 = pneg %p4278_p10 }
  0x23   : > { %p4286_p6 = pnand %p4285_p0, %p4279_p1 }
  0x25   : > { %4289 = shalt.err (!%p4286_p6)
}
  0x26   : > { %s4422_s15 = smov 128   ;;  %s4423_s16 = smov 8  }
  0x27   : > { %4205 = dma.hbm_to_vmem [thread:$0]  (!%p4510_p11), %s5162_s1, 4608, %s4503_s28, [#allocation8], %s4422_s15, %s4422_s15, %s4423_s16  }
  0x28   : > { %s4290_s7 = scalar_lea.hbm %s5164_s3, 4608 }
  0x29   : > { %p4291_p1 = scmp.ne.s32.totalorder %s5164_s3, %s4290_s7  ;;  %p4297_p10 = scmp.lt.u32.totalorder %s4290_s7, %s5164_s3 }
  0x2b   : > { %p4293_p2 = pnand %p4291_p1, %p4264_p13 }
  0x2d   : > { %p4294_p6 = pneg %p4293_p2 }
  0x2f   : > { %p4299_p3 = pnand %p4297_p10, %p4294_p6 }
  0x31   : > { %4302 = shalt.err (!%p4299_p3)
}
  0x32   : > { %s4303_s28 = scalar_lea.vmem %s4514_s6, 4608  ;;  %p4311_p12 = scmp.lt.s32.totalorder %s4514_s6, %s4514_s6 }
  0x33   : > { %p4304_p5 = scmp.ne.s32.totalorder %s4514_s6, %s4303_s28  ;;  %p4312_p0 = scmp.lt.s32.totalorder %s4303_s28, %s4303_s28 }
  0x35   : > { %p4306_p7 = pnand %p4304_p5, %p4264_p13  ;;  %p4313_p1 = por %p4312_p0, %p4311_p12 }
  0x37   : > { %p4307_p9 = pneg %p4306_p7 }
  0x39   : > { %p4314_p2 = pnand %p4313_p1, %p4307_p9 }
  0x3b   : > { %4317 = shalt.err (!%p4314_p2)
}
  0x3c   : > { %4208 = dma.hbm_to_vmem [thread:$0]  (!%p4510_p11), %s5164_s3, 4608, %s4514_s6, [#allocation8], %s4422_s15, %s4422_s15, %s4423_s16  }
  0x3d   : > { %s4575_s29 = sadd.s32 1, %s4418_s21   ;;  %s29_s14 = sadd.s32 1, %s4414_s20 }
  0x3e   : > { %s26_s17 = ssub.s32 %s4418_s21, %s4575_s29  ;;  %p36_p13 = scmp.ne.s32.totalorder %s4414_s20, %s4410_s19 }
  0x3f   : > { %p27_p6 = scmp.eq.s32.totalorder %s26_s17, 0  ;;  %p37_p10 = scmp.eq.s32.totalorder %s4418_s21, 0 }
  0x40   : > { %p5174_p3 = scmp.eq.s32.totalorder %s4480_s22, 1  ;;  %p4219_p7 = scmp.lt.s32.totalorder %s4418_s21, 2 }
  0x41   : > { %s4591_s27 = scalar_select %p27_p6, %s4414_s20, %s29_s14  }
  0x42   : > { %p4585_p5 = por %p5174_p3, %p36_p13  ;;  %p38_p9 = por %p37_p10, %p36_p13 }
  0x43   : > { %s208_s30 = sand.u32 1, %s4414_s20   ;;  %s3340_s6 = sshll.u32 %s4418_s21, 10 }
  0x44   : > { %s5175_s23 = scalar_select %p4585_p5, 1, 0 }
  0x45   : > { %s3181_s7 = sshll.u32 %s208_s30, 6  ;;  %s4598_s10 = scalar_lea.hbm %s5161_s0, %s3340_s6 }
  0x46   : > { %s212_s11 = scalar_lea.vmem [#allocation4], %s3181_s7  ;;  %p4602_p11 = pnand %p4219_p7, %p38_p9 }
  0x47   : > { %s219_s28 = sshll.u32 %s212_s11, 4  ;;  %s4606_s13 = scalar_lea.sflag [#allocation5], %s208_s30  ;;  %s4600_s28 = int_to_ptr.vmem [resolvable:$true] %s219_s28 }
  0x48   : > { %s4318_s14 = scalar_lea.hbm %s4598_s10, 1024  ;;  %p4320_p0 = pneg %p4602_p11 }
  0x49   : > { %p4319_p12 = scmp.ne.s32.totalorder %s4598_s10, %s4318_s14  ;;  %s4323_s6 = scalar_lea.hbm %s5161_s0, 2048 }
  0x4a   : > { %p4324_p13 = scmp.lt.u32.totalorder %s4598_s10, %s5161_s0  ;;  %p4325_p6 = scmp.lt.u32.totalorder %s4323_s6, %s4318_s14 }
  0x4b   : > { %p4321_p1 = pnand %p4320_p0, %p4319_p12  ;;  %p4327_p3 = scmp.lt.u32.totalorder %s4318_s14, %s4598_s10 }
  0x4c   : > { %p4326_p10 = por %p4325_p6, %p4324_p13 }
  0x4d   : > { %p4322_p2 = pneg %p4321_p1 }
  0x4e   : > { %p4328_p7 = por %p4327_p3, %p4326_p10 }
  0x50   : > { %p4329_p9 = pnand %p4328_p7, %p4322_p2 }
  0x52   : > { %4332 = shalt.err (!%p4329_p9)
}
  0x53   : > { %s4333_s30 = scalar_lea.vmem %s4600_s28, 1024  ;;  %s4424_s11 = smov [#allocation4]  }
  0x54   : > { %p4334_p12 = scmp.ne.s32.totalorder %s4600_s28, %s4333_s30  ;;  %s4338_s17 = sshll.u32 %s4424_s11, 4  ;;  %s4339_s17 = int_to_ptr.vmem [resolvable:$false] %s4338_s17 }
  0x55   : > { %s4340_s7 = scalar_lea.vmem %s4339_s17, 2048  ;;  %p4341_p4 = scmp.lt.s32.totalorder %s4600_s28, %s4339_s17 }
  0x56   : > { %p4336_p1 = pnand %p4334_p12, %p4320_p0  ;;  %p4342_p13 = scmp.lt.s32.totalorder %s4340_s7, %s4333_s30 }
  0x58   : > { %p4337_p5 = pneg %p4336_p1  ;;  %p4343_p6 = por %p4342_p13, %p4341_p4 }
  0x5a   : > { %p4344_p10 = pnand %p4343_p6, %p4337_p5 }
  0x5c   : > { %4347 = shalt.err (!%p4344_p10)
}
  0x5d   : > { %4212 = dma.hbm_to_vmem [thread:$0]  (!%p4602_p11), %s4598_s10, 1024, %s4600_s28, %s4606_s13, %s4422_s15, %s4422_s15, %s4423_s16  }
  0x5e   : > { %231 = sbr.rel (%p4499_p8) target bundleno = 861 (0x35d), region = 40  ;;  %s4640_s14 = sand.u32 (!%p4499_p8), 1, %s4410_s19  }
  0x5f   : > { %s3185_s6 = sshll.u32 (!%p4499_p8), %s4640_s14, 6  ;;  %s234_s8 = scalar_lea.sflag (!%p4499_p8), [#allocation5], %s4640_s14 }
  0x60   : > { %s4646_s12 = scalar_lea.vmem (!%p4499_p8), [#allocation4], %s3185_s6  ;;  %p5177_p4 = scmp.ne.s32.totalorder (!%p4499_p8), %s5170_s24, 0 }
  0x65   : > { %4393 = dma.done.wait (%p5177_p4), %s234_s8, 1024  }
  0x66   : > { %4395 = vsyncadd (%p5177_p4), %s234_s8, 4294966272  ;;  %p5178_p5 = scmp.eq.s32.totalorder %s4480_s22, 0 }
  0x68   : > { %4397 = dma.done.wait (%p5178_p5), [#allocation8], 9216   ;;  %p5179_p8 = pmov %p5178_p5 }
  0x69   : > { %vm280_vm0 = vcmask 261120   ;;  %vm282_vm1 = vcmask 254976   ;;  %v4425_v0 = vmov 0.0   ;;  %v332_v1 = vld [vmem:[#allocation7 + $0x20] sm:$0xff]  ;;  %v333_v2 = vld [vmem:[#allocation7 + $0x28] sm:$0xff]  ;;  %v334_v3 = vld [vmem:[#allocation7 + $0x30] sm:$0xff] }
  0x6a   : > { %4399 = vsyncadd (%p5179_p8), [#allocation8], 4294958080  ;;  %281 = vst.msk [vmem:[#allocation2] sm:$0xff] %vm280_vm0, %v4425_v0  ;;  %v3918_v4 = vpack.c.bf16 %v333_v2, %v332_v1  ;;  %v335_v5 = vld [vmem:[#allocation7 + $0x38] sm:$0xff]  ;;  %v4697_v7 = vld [vmem:[%s4646_s12] sm:$0xff]  ;;  %s5086_s10 = scalar_lea.vmem [#allocation10], %s3185_s6 }
  0x6b   : > { %283 = vst.msk [vmem:[#allocation2 + $0x8] sm:$0x3] %vm282_vm1, %v4425_v0  ;;  %285 = vst.msk [vmem:[#allocation2 + $0x18] sm:$0x3] %vm282_vm1, %v4425_v0  ;;  %v3922_v8 = vpack.c.bf16 %v335_v5, %v334_v3  ;;  %v319_v9 = vld [vmem:[#allocation7] sm:$0xff]  ;;  %v320_v10 = vld [vmem:[#allocation7 + $0x8] sm:$0xff] }
  0x6c   : > { %284 = vst.msk [vmem:[#allocation2 + $0x10] sm:$0xff] %vm280_vm0, %v4425_v0  ;;  %286 = vst.msk [vmem:[#allocation2 + $0x20] sm:$0xff] %vm280_vm0, %v4425_v0  ;;  %v4703_v11 = vld [vmem:[%s4646_s12 + $0x8] sm:$0xff]  ;;  %3919 = vmatprep.subr.bf16.mxu0 %v3918_v4  ;;  %v4708_v12 = vld [vmem:[%s4646_s12 + $0x10] sm:$0xff]  ;;  %v3926_v16 = vpack.c.bf16 %v320_v10, %v319_v9  ;;  %s3341_s28 = sshll.u32 %s4480_s22, 10  ;;  %s3084_s13 = sshll.u32 %s5086_s10, 4  ;;  %s5113_s13 = int_to_ptr.vmem [resolvable:$true] %s3084_s13 }
  0x6d   : > { %287 = vst.msk [vmem:[#allocation2 + $0x28] sm:$0x3] %vm282_vm1, %v4425_v0  ;;  %289 = vst.msk [vmem:[#allocation2 + $0x38] sm:$0x3] %vm282_vm1, %v4425_v0  ;;  %v4711_v13 = vld [vmem:[%s4646_s12 + $0x18] sm:$0xff]  ;;  %v4714_v14 = vld [vmem:[%s4646_s12 + $0x20] sm:$0xff]  ;;  %3921 = vmatpush3.bf16.msra.mxu0 %v3918_v4  ;;  %s5111_s11 = scalar_lea.hbm %s5166_s5, %s3341_s28 }
  0x6e   : > { %288 = vst.msk [vmem:[#allocation2 + $0x30] sm:$0xff] %vm280_vm0, %v4425_v0  ;;  %290 = vst.msk [vmem:[#allocation2 + $0x40] sm:$0xff] %vm280_vm0, %v4425_v0  ;;  %v4723_v15 = vld [vmem:[%s4646_s12 + $0x28] sm:$0xff]  ;;  %3923 = vmatprep.subr.bf16.mxu0 %v3922_v8  ;;  %v4728_v17 = vld [vmem:[%s4646_s12 + $0x30] sm:$0xff]  ;;  %s3071_s22 = scalar_lea.sflag [#allocation6], %s4640_s14  ;;  %s4348_s17 = scalar_lea.vmem %s5113_s13, 1024 }
  0x6f   : > { %291 = vst.msk [vmem:[#allocation2 + $0x48] sm:$0x3] %vm282_vm1, %v4425_v0  ;;  %293 = vst.msk [vmem:[#allocation2 + $0x58] sm:$0x3] %vm282_vm1, %v4425_v0  ;;  %v321_v18 = vld [vmem:[#allocation7 + $0x10] sm:$0xff]  ;;  %v322_v19 = vld [vmem:[#allocation7 + $0x18] sm:$0xff]  ;;  %p4349_p11 = scmp.ne.s32.totalorder %s5113_s13, %s4348_s17 }
  0x70   : > { %292 = vst.msk [vmem:[#allocation2 + $0x50] sm:$0xff] %vm280_vm0, %v4425_v0  ;;  %294 = vst.msk [vmem:[#allocation2 + $0x60] sm:$0xff] %vm280_vm0, %v4425_v0  ;;  %v3930_v21 = vpack.c.bf16 %v322_v19, %v321_v18  ;;  %v603_v23 = vld [vmem:[#allocation7 + $0x40] sm:$0xff]  ;;  %v604_v24 = vld [vmem:[#allocation7 + $0x48] sm:$0xff]  ;;  %p5180_p0 = scmp.ne.s32.totalorder %s5175_s23, 0  ;;  %s4426_s7 = smov [#allocation10]  }
  0x71   : > { %295 = vst.msk [vmem:[#allocation2 + $0x68] sm:$0x3] %vm282_vm1, %v4425_v0  ;;  %297 = vst.msk [vmem:[#allocation2 + $0x78] sm:$0x3] %vm282_vm1, %v4425_v0  ;;  %3925 = vmatpush3.bf16.msra.mxu0 %v3922_v8  ;;  %v3934_v27 = vpack.c.bf16 %v604_v24, %v603_v23  ;;  %v4753_v30 = vld [vmem:[%s4646_s12 + $0x38] sm:$0xff]  ;;  %v311_v32 = vld [vmem:[#allocation2] sm:$0xff] }
  0x72   : > { %296 = vst.msk [vmem:[#allocation2 + $0x70] sm:$0xff] %vm280_vm0, %v4425_v0  ;;  %298 = vst.msk [vmem:[#allocation2 + $0x80] sm:$0xff] %vm280_vm0, %v4425_v0  ;;  %v323_v6 = vld [vmem:[#allocation2 + $0x1] sm:$0xff]  ;;  %3927 = vmatprep.subr.bf16.mxu0 %v3926_v16  ;;  %v605_v33 = vld [vmem:[#allocation7 + $0x50] sm:$0xff]  ;;  %p4350_p2 = pnand %p4349_p11, %p5180_p0  ;;  %s4352_s6 = sshll.u32 %s4426_s7, 4  ;;  %s4353_s6 = int_to_ptr.vmem [resolvable:$false] %s4352_s6 }
  0x73   : > { %299 = vst.msk [vmem:[#allocation2 + $0x88] sm:$0x3] %vm282_vm1, %v4425_v0  ;;  %301 = vst.msk [vmem:[#allocation2 + $0x98] sm:$0x3] %vm282_vm1, %v4425_v0  ;;  %3566 = vmatprep.mubr.msk.f32.mxu0 %vm280_vm0, %v323_v6  ;;  %v606_v34 = vld [vmem:[#allocation7 + $0x58] sm:$0xff]  ;;  %v753_v38 = vld [vmem:[#allocation7 + $0x60] sm:$0xff]  ;;  %p4355_p7 = scmp.lt.s32.totalorder %s5113_s13, %s4353_s6 }
  0x74   : > { %300 = vst.msk [vmem:[#allocation2 + $0x90] sm:$0xff] %vm280_vm0, %v4425_v0  ;;  %1668 = vst.msk [vmem:[#allocation3] sm:$0xff] %vm280_vm0, %v4425_v0  ;;  %v3938_v37 = vpack.c.bf16 %v606_v34, %v605_v33  ;;  %v754_v39 = vld [vmem:[#allocation7 + $0x68] sm:$0xff]  ;;  %v755_v47 = vld [vmem:[#allocation7 + $0x70] sm:$0xff]  ;;  %p4351_p3 = pneg %p4350_p2  ;;  %s4354_s8 = scalar_lea.vmem %s4353_s6, 2048 }
  0x75   : > { %1669 = vst.msk [vmem:[#allocation3 + $0x8] sm:$0x3] %vm282_vm1, %v4425_v0  ;;  %1671 = vst.msk [vmem:[#allocation3 + $0x18] sm:$0x3] %vm282_vm1, %v4425_v0  ;;  %v3942_v42 = vpack.c.bf16 %v754_v39, %v753_v38  ;;  %v594_v46 = vld [vmem:[#allocation2 + $0x2] sm:$0xff]  ;;  %v756_v48 = vld [vmem:[#allocation7 + $0x78] sm:$0xff]  ;;  %p4356_p9 = scmp.lt.s32.totalorder %s4354_s8, %s4348_s17 }
  0x76   : > { %1670 = vst.msk [vmem:[#allocation3 + $0x10] sm:$0xff] %vm280_vm0, %v4425_v0  ;;  %1672 = vst.msk [vmem:[#allocation3 + $0x20] sm:$0xff] %vm280_vm0, %v4425_v0  ;;  %v3946_v51 = vpack.c.bf16 %v756_v48, %v755_v47  ;;  %v903_v52 = vld [vmem:[#allocation7 + $0x80] sm:$0xff]  ;;  %v904_v53 = vld [vmem:[#allocation7 + $0x88] sm:$0xff] }
  0x77   : > { %1673 = vst.msk [vmem:[#allocation3 + $0x28] sm:$0x3] %vm282_vm1, %v4425_v0  ;;  %1675 = vst.msk [vmem:[#allocation3 + $0x38] sm:$0x3] %vm282_vm1, %v4425_v0  ;;  %v3950_v56 = vpack.c.bf16 %v904_v53, %v903_v52  ;;  %v905_v60 = vld [vmem:[#allocation7 + $0x90] sm:$0xff]  ;;  %v906_v61 = vld [vmem:[#allocation7 + $0x98] sm:$0xff]  ;;  %p4357_p12 = por %p4356_p9, %p4355_p7 }
  0x78   : > { %1674 = vst.msk [vmem:[#allocation3 + $0x30] sm:$0xff] %vm280_vm0, %v4425_v0  ;;  %1676 = vst.msk [vmem:[#allocation3 + $0x40] sm:$0xff] %vm280_vm0, %v4425_v0  ;;  %v3954_v62 = vpack.c.bf16 %v906_v61, %v905_v60  ;;  %v1053_v63 = vld [vmem:[#allocation7 + $0xa0] sm:$0xff]  ;;  %v1055_v3 = vld [vmem:[#allocation7 + $0xb0] sm:$0xff] }
  0x79   : > { %1677 = vst.msk [vmem:[#allocation3 + $0x48] sm:$0x3] %vm282_vm1, %v4425_v0  ;;  %1679 = vst.msk [vmem:[#allocation3 + $0x58] sm:$0x3] %vm282_vm1, %v4425_v0  ;;  %v1056_v4 = vld [vmem:[#allocation7 + $0xb8] sm:$0xff]  ;;  %v1204_v6 = vld [vmem:[#allocation7 + $0xc0] sm:$0xff]  ;;  %p4358_p1 = pnand %p4357_p12, %p4351_p3 }
  0x7a   : > { %1678 = vst.msk [vmem:[#allocation3 + $0x50] sm:$0xff] %vm280_vm0, %v4425_v0  ;;  %1680 = vst.msk [vmem:[#allocation3 + $0x60] sm:$0xff] %vm280_vm0, %v4425_v0  ;;  %v3962_v5 = vpack.c.bf16 %v1056_v4, %v1055_v3  ;;  %v1205_v8 = vld [vmem:[#allocation7 + $0xc8] sm:$0xff]  ;;  %v1207_v18 = vld [vmem:[#allocation7 + $0xd8] sm:$0xff] }
  0x7b   : > { %1681 = vst.msk [vmem:[#allocation3 + $0x68] sm:$0x3] %vm282_vm1, %v4425_v0  ;;  %1683 = vst.msk [vmem:[#allocation3 + $0x78] sm:$0x3] %vm282_vm1, %v4425_v0  ;;  %v3966_v9 = vpack.c.bf16 %v1205_v8, %v1204_v6  ;;  %v1504_v34 = vld [vmem:[#allocation7 + $0x100] sm:$0xff]  ;;  %v1506_v38 = vld [vmem:[#allocation7 + $0x110] sm:$0xff] }
  0x7c   : > { %1682 = vst.msk [vmem:[#allocation3 + $0x70] sm:$0xff] %vm280_vm0, %v4425_v0  ;;  %1684 = vst.msk [vmem:[#allocation3 + $0x80] sm:$0xff] %vm280_vm0, %v4425_v0  ;;  %v1507_v39 = vld [vmem:[#allocation7 + $0x118] sm:$0xff]  ;;  %v3261_v47 = vld [vmem:[%s5163_s2] ss:$0 sm:$0xff] }
  0x7d   : > { %1685 = vst.msk [vmem:[#allocation3 + $0x88] sm:$0x3] %vm282_vm1, %v4425_v0  ;;  %1687 = vst.msk [vmem:[#allocation3 + $0x98] sm:$0x3] %vm282_vm1, %v4425_v0 }
  0x7e   : > { %1686 = vst.msk [vmem:[#allocation3 + $0x90] sm:$0xff] %vm280_vm0, %v4425_v0  ;;  %303 = vst.msk [vmem:[#allocation2 + $0x11] sm:$0xff] %vm280_vm0, %v4697_v7  ;;  %v1054_v0 = vld [vmem:[#allocation7 + $0xa8] sm:$0xff] }
  0x7f   : > { %304 = vst.msk [vmem:[#allocation2 + $0x21] sm:$0xff] %vm280_vm0, %v4703_v11  ;;  %305 = vst.msk [vmem:[#allocation2 + $0x31] sm:$0xff] %vm280_vm0, %v4708_v12  ;;  %v3958_v1 = vpack.c.bf16 %v1054_v0, %v1053_v63  ;;  %v1707_v63 = vld [vmem:[#allocation9 + $0x10] sm:$0xff]  ;;  %v1708_v0 = vld [vmem:[#allocation9 + $0x18] sm:$0xff] }
  0x80   : > { %306 = vst.msk [vmem:[#allocation2 + $0x41] sm:$0xff] %vm280_vm0, %v4711_v13  ;;  %307 = vst.msk [vmem:[#allocation2 + $0x51] sm:$0xff] %vm280_vm0, %v4714_v14 }
  0x81   : > { %308 = vst.msk [vmem:[#allocation2 + $0x61] sm:$0xff] %vm280_vm0, %v4723_v15  ;;  %309 = vst.msk [vmem:[#allocation2 + $0x71] sm:$0xff] %vm280_vm0, %v4728_v17 }
  0x82   : > { %310 = vst.msk [vmem:[#allocation2 + $0x81] sm:$0xff] %vm280_vm0, %v4753_v30 }
  0x85   : > { %v4732_v20 = vld [vmem:[#allocation2 + $0x11] sm:$0xff] }
  0x86   : > { %v4734_v22 = vld [vmem:[#allocation2 + $0x21] sm:$0xff]  ;;  %3567 = vmatmul.mubr.msk.f32.vlgmr.msra.gmra.mrb[0].mxu0 %vm280_vm0, %v4732_v20  ;;  %v4740_v25 = vld [vmem:[#allocation2 + $0x31] sm:$0xff] }
  0x87   : > { %3929 = vmatpush3.bf16.msra.mxu0 %v3926_v16  ;;  %3569 = vmatprep.mubr.msk.f32.mxu0 %vm280_vm0, %v4734_v22  ;;  %v4742_v26 = vld [vmem:[#allocation2 + $0x41] sm:$0xff]  ;;  %v4748_v28 = vld [vmem:[#allocation2 + $0x51] sm:$0xff] }
  0x88   : > { %3931 = vmatprep.subr.bf16.mxu0 %v3930_v21  ;;  %v4750_v29 = vld [vmem:[#allocation2 + $0x61] sm:$0xff]  ;;  %v4761_v31 = vld [vmem:[#allocation2 + $0x71] sm:$0xff] }
  0x89   : > { %v312_v35 = vld [vmem:[#allocation2 + $0x10] sm:$0xff]  ;;  %v4766_v36 = vld [vmem:[#allocation2 + $0x20] sm:$0xff] }
  0x8a   : > { %3570 = vmatmul.mubr.msk.f32.gmra.mrb[2].mxu0 %vm280_vm0, %v4740_v25  ;;  %v4771_v40 = vld [vmem:[#allocation2 + $0x30] sm:$0xff]  ;;  %v4773_v41 = vld [vmem:[#allocation2 + $0x40] sm:$0xff] }
  0x8b   : > { %3572 = vmatprep.mubr.msk.f32.mxu0 %vm280_vm0, %v4742_v26  ;;  %3933 = vmatpush3.bf16.msra.mxu0 %v3930_v21  ;;  %v4779_v43 = vld [vmem:[#allocation2 + $0x50] sm:$0xff]  ;;  %v4781_v44 = vld [vmem:[#allocation2 + $0x60] sm:$0xff]  ;;  %v1355_v21 = vld [vmem:[#allocation7 + $0xe8] sm:$0xff] }
  0x8c   : > { %3935 = vmatprep.subr.bf16.mxu0 %v3934_v27  ;;  %v4787_v45 = vld [vmem:[#allocation2 + $0x70] sm:$0xff]  ;;  %v4792_v50 = vld [vmem:[#allocation2 + $0x22] sm:$0xff] }
  0x8d   : > { %v595_v49 = vld [vmem:[#allocation2 + $0x12] sm:$0xff]  ;;  %v4799_v55 = vld [vmem:[#allocation2 + $0x42] sm:$0xff] }
  0x8e   : > { %3573 = vmatmul.mubr.msk.f32.gmra.mrb[4].mxu0 %vm280_vm0, %v4748_v28  ;;  %v4797_v54 = vld [vmem:[#allocation2 + $0x32] sm:$0xff]  ;;  %v4807_v58 = vld [vmem:[#allocation2 + $0x62] sm:$0xff] }
  0x8f   : > { %3575 = vmatprep.mubr.msk.f32.mxu0 %vm280_vm0, %v4750_v29  ;;  %v4805_v57 = vld [vmem:[#allocation2 + $0x52] sm:$0xff]  ;;  %v751_v2 = vld [vmem:[#allocation2 + $0x80] sm:$0xff] }
  0x90   : > { %v4813_v59 = vld [vmem:[#allocation2 + $0x72] sm:$0xff]  ;;  %v901_v10 = vld [vmem:[#allocation2 + $0x81] sm:$0xff] }
  0x91   : > { %v1206_v16 = vld [vmem:[#allocation7 + $0xd0] sm:$0xff]  ;;  %v1051_v24 = vld [vmem:[#allocation2 + $0x82] sm:$0xff] }
  0x92   : > { %3576 = vmatmul.mubr.msk.f32.gmra.mrb[6].mxu0 %vm280_vm0, %v4761_v31  ;;  %v3970_v19 = vpack.c.bf16 %v1207_v18, %v1206_v16  ;;  %v1990_v16 = vld [vmem:[#allocation9 + $0x48] sm:$0xff] }
  0x93   : > { %3586 = vmatprep.mubr.msk.f32.mxu0 %vm280_vm0, %v311_v32  ;;  %v1357_v32 = vld [vmem:[#allocation7 + $0xf8] sm:$0xff] }
  0x96   : > { %3587 = vmatmul.mubr.msk.f32.vlgmr.msra.gmra.mrb[0].mxu0 %vm280_vm0, %v312_v35 }
  0x97   : > { %3937 = vmatpush3.bf16.msra.mxu0 %v3934_v27  ;;  %3589 = vmatprep.mubr.msk.f32.mxu0 %vm280_vm0, %v4766_v36  ;;  %v1356_v27 = vld [vmem:[#allocation7 + $0xf0] sm:$0xff] }
  0x98   : > { %3939 = vmatprep.subr.bf16.mxu0 %v3938_v37  ;;  %v3978_v33 = vpack.c.bf16 %v1357_v32, %v1356_v27 }
  0x9a   : > { %3590 = vmatmul.mubr.msk.f32.gmra.mrb[2].mxu0 %vm280_vm0, %v4771_v40 }
  0x9b   : > { %3592 = vmatprep.mubr.msk.f32.mxu0 %vm280_vm0, %v4773_v41  ;;  %3941 = vmatpush3.bf16.msra.mxu0 %v3938_v37 }
  0x9c   : > { %3943 = vmatprep.subr.bf16.mxu0 %v3942_v42 }
  0x9e   : > { %3593 = vmatmul.mubr.msk.f32.gmra.mrb[4].mxu0 %vm280_vm0, %v4779_v43 }
  0x9f   : > { %3595 = vmatprep.mubr.msk.f32.mxu0 %vm280_vm0, %v4781_v44 }
  0xa2   : > { %3596 = vmatmul.mubr.msk.f32.gmra.mrb[6].mxu0 %vm280_vm0, %v4787_v45 }
  0xa3   : > { %3606 = vmatprep.mubr.msk.f32.mxu0 %vm280_vm0, %v594_v46 }
  0xa6   : > { %3607 = vmatmul.mubr.msk.f32.vlgmr.msra.gmra.mrb[0].mxu0 %vm280_vm0, %v595_v49 }
  0xa7   : > { %3945 = vmatpush3.bf16.msra.mxu0 %v3942_v42  ;;  %3609 = vmatprep.mubr.msk.f32.mxu0 %vm280_vm0, %v4792_v50 }
  0xa8   : > { %3947 = vmatprep.subr.bf16.mxu0 %v3946_v51 }
  0xaa   : > { %3610 = vmatmul.mubr.msk.f32.gmra.mrb[2].mxu0 %vm280_vm0, %v4797_v54 }
  0xab   : > { %3612 = vmatprep.mubr.msk.f32.mxu0 %vm280_vm0, %v4799_v55  ;;  %3949 = vmatpush3.bf16.msra.mxu0 %v3946_v51 }
  0xac   : > { %3951 = vmatprep.subr.bf16.mxu0 %v3950_v56 }
  0xae   : > { %3613 = vmatmul.mubr.msk.f32.gmra.mrb[4].mxu0 %vm280_vm0, %v4805_v57 }
  0xaf   : > { %3615 = vmatprep.mubr.msk.f32.mxu0 %vm280_vm0, %v4807_v58 }
  0xb2   : > { %3616 = vmatmul.mubr.msk.f32.gmra.mrb[6].mxu0 %vm280_vm0, %v4813_v59 }
  0xb3   : > { %3626 = vmatprep.mubr.msk.f32.mxu0 %vm280_vm0, %v312_v35  ;;  %v1505_v35 = vld [vmem:[#allocation7 + $0x108] sm:$0xff] }
  0xb4   : > { %v3982_v37 = vpack.c.bf16 %v1505_v35, %v1504_v34  ;;  %v1697_v34 = vld [vmem:[#allocation3] sm:$0xff] }
  0xb6   : > { %3627 = vmatmul.mubr.msk.f32.vlgmr.msra.gmra.mrb[0].mxu0 %vm280_vm0, %v4766_v36 }
  0xb7   : > { %3953 = vmatpush3.bf16.msra.mxu0 %v3950_v56  ;;  %3629 = vmatprep.mubr.msk.f32.mxu0 %vm280_vm0, %v4771_v40 }
  0xb8   : > { %3955 = vmatprep.subr.bf16.mxu0 %v3954_v62 }
  0xba   : > { %3630 = vmatmul.mubr.msk.f32.gmra.mrb[2].mxu0 %vm280_vm0, %v4773_v41 }
  0xbb   : > { %3632 = vmatprep.mubr.msk.f32.mxu0 %vm280_vm0, %v4779_v43  ;;  %3957 = vmatpush3.bf16.msra.mxu0 %v3954_v62 }
  0xbc   : > { %3959 = vmatprep.subr.bf16.mxu0 %v3958_v1 }
  0xbe   : > { %3633 = vmatmul.mubr.msk.f32.gmra.mrb[4].mxu0 %vm280_vm0, %v4781_v44 }
  0xbf   : > { %3635 = vmatprep.mubr.msk.f32.mxu0 %vm280_vm0, %v4787_v45 }
  0xc2   : > { %3636 = vmatmul.mubr.msk.f32.gmra.mrb[6].mxu0 %vm280_vm0, %v751_v2 }
  0xc3   : > { %3646 = vmatprep.mubr.msk.f32.mxu0 %vm280_vm0, %v4732_v20  ;;  %v1354_v20 = vld [vmem:[#allocation7 + $0xe0] sm:$0xff] }
  0xc4   : > { %v3974_v23 = vpack.c.bf16 %v1355_v21, %v1354_v20 }
  0xc6   : > { %3647 = vmatmul.mubr.msk.f32.vlgmr.msra.gmra.mrb[0].mxu0 %vm280_vm0, %v4734_v22 }
  0xc7   : > { %3961 = vmatpush3.bf16.msra.mxu0 %v3958_v1  ;;  %3649 = vmatprep.mubr.msk.f32.mxu0 %vm280_vm0, %v4740_v25 }
  0xc8   : > { %3963 = vmatprep.subr.bf16.mxu0 %v3962_v5 }
  0xca   : > { %3650 = vmatmul.mubr.msk.f32.gmra.mrb[2].mxu0 %vm280_vm0, %v4742_v26 }
  0xcb   : > { %3652 = vmatprep.mubr.msk.f32.mxu0 %vm280_vm0, %v4748_v28  ;;  %3965 = vmatpush3.bf16.msra.mxu0 %v3962_v5  ;;  %v4002_v5 = vpack.c.bf16 %v1708_v0, %v1707_v63  ;;  %v2441_v0 = vld [vmem:[#allocation9 + $0xb0] sm:$0xff] }
  0xcc   : > { %3967 = vmatprep.subr.bf16.mxu0 %v3966_v9 }
  0xce   : > { %3653 = vmatmul.mubr.msk.f32.gmra.mrb[4].mxu0 %vm280_vm0, %v4750_v29 }
  0xcf   : > { %3655 = vmatprep.mubr.msk.f32.mxu0 %vm280_vm0, %v4761_v31 }
  0xd2   : > { %3656 = vmatmul.mubr.msk.f32.gmra.mrb[6].mxu0 %vm280_vm0, %v901_v10 }
  0xd3   : > { %3666 = vmatprep.mubr.msk.f32.mxu0 %vm280_vm0, %v595_v49 }
  0xd6   : > { %3667 = vmatmul.mubr.msk.f32.vlgmr.msra.gmra.mrb[0].mxu0 %vm280_vm0, %v4792_v50 }
  0xd7   : > { %3969 = vmatpush3.bf16.msra.mxu0 %v3966_v9  ;;  %3669 = vmatprep.mubr.msk.f32.mxu0 %vm280_vm0, %v4797_v54 }
  0xd8   : > { %3971 = vmatprep.subr.bf16.mxu0 %v3970_v19 }
  0xda   : > { %3670 = vmatmul.mubr.msk.f32.gmra.mrb[2].mxu0 %vm280_vm0, %v4799_v55 }
  0xdb   : > { %3672 = vmatprep.mubr.msk.f32.mxu0 %vm280_vm0, %v4805_v57  ;;  %3973 = vmatpush3.bf16.msra.mxu0 %v3970_v19 }
  0xdc   : > { %3975 = vmatprep.subr.bf16.mxu0 %v3974_v23 }
  0xde   : > { %3673 = vmatmul.mubr.msk.f32.gmra.mrb[4].mxu0 %vm280_vm0, %v4807_v58 }
  0xdf   : > { %3675 = vmatprep.mubr.msk.f32.mxu0 %vm280_vm0, %v4813_v59 }
  0xe2   : > { %3676 = vmatmul.mubr.msk.f32.gmra.mrb[6].mxu0 %vm280_vm0, %v1051_v24 }
  0xe3   : > { %3686 = vmatprep.mubr.msk.f32.mxu0 %vm280_vm0, %v4766_v36  ;;  %v1202_v36 = vld [vmem:[#allocation2 + $0x90] sm:$0xff] }
  0xe6   : > { %3687 = vmatmul.mubr.msk.f32.vlgmr.msra.gmra.mrb[0].mxu0 %vm280_vm0, %v4771_v40  ;;  %v3986_v40 = vpack.c.bf16 %v1507_v39, %v1506_v38 }
  0xe7   : > { %3977 = vmatpush3.bf16.msra.mxu0 %v3974_v23  ;;  %3689 = vmatprep.mubr.msk.f32.mxu0 %vm280_vm0, %v4773_v41  ;;  %v1721_v41 = vld [vmem:[#allocation9 + $0x38] sm:$0xff] }
  0xe8   : > { %3979 = vmatprep.subr.bf16.mxu0 %v3978_v33 }
  0xea   : > { %3690 = vmatmul.mubr.msk.f32.gmra.mrb[2].mxu0 %vm280_vm0, %v4779_v43  ;;  %v1709_v43 = vld [vmem:[#allocation3 + $0x1] sm:$0xff] }
  0xeb   : > { %3692 = vmatprep.mubr.msk.f32.mxu0 %vm280_vm0, %v4781_v44  ;;  %3981 = vmatpush3.bf16.msra.mxu0 %v3978_v33  ;;  %v1705_v44 = vld [vmem:[#allocation9] sm:$0xff] }
  0xec   : > { %3983 = vmatprep.subr.bf16.mxu0 %v3982_v37  ;;  %3746 = vmatprep.mubr.msk.f32.mxu1 %vm280_vm0, %v1709_v43 }
  0xee   : > { %3693 = vmatmul.mubr.msk.f32.gmra.mrb[4].mxu0 %vm280_vm0, %v4787_v45  ;;  %v1706_v45 = vld [vmem:[#allocation9 + $0x8] sm:$0xff] }
  0xef   : > { %3695 = vmatprep.mubr.msk.f32.mxu0 %vm280_vm0, %v751_v2  ;;  %v3998_v46 = vpack.c.bf16 %v1706_v45, %v1705_v44  ;;  %v2141_v44 = vld [vmem:[#allocation9 + $0x70] sm:$0xff]  ;;  %v2142_v45 = vld [vmem:[#allocation9 + $0x78] sm:$0xff] }
  0xf2   : > { %3696 = vmatmul.mubr.msk.f32.gmra.mrb[6].mxu0 %vm280_vm0, %v1202_v36  ;;  %v1992_v36 = vld [vmem:[#allocation9 + $0x58] sm:$0xff] }
  0xf3   : > { %3706 = vmatprep.mubr.msk.f32.mxu0 %vm280_vm0, %v4734_v22  ;;  %v1352_v22 = vld [vmem:[#allocation2 + $0x91] sm:$0xff] }
  0xf6   : > { %3707 = vmatmul.mubr.msk.f32.vlgmr.msra.gmra.mrb[0].mxu0 %vm280_vm0, %v4740_v25  ;;  %v1502_v25 = vld [vmem:[#allocation2 + $0x92] sm:$0xff] }
  0xf7   : > { %3985 = vmatpush3.bf16.msra.mxu0 %v3982_v37  ;;  %3709 = vmatprep.mubr.msk.f32.mxu0 %vm280_vm0, %v4742_v26  ;;  %v1718_v26 = vld [vmem:[#allocation9 + $0x20] sm:$0xff]  ;;  %v1991_v37 = vld [vmem:[#allocation9 + $0x50] sm:$0xff] }
  0xf8   : > { %3987 = vmatprep.subr.bf16.mxu0 %v3986_v40  ;;  %v4010_v38 = vpack.c.bf16 %v1992_v36, %v1991_v37  ;;  %v2890_v36 = vld [vmem:[#allocation9 + $0x100] sm:$0xff] }
  0xfa   : > { %3710 = vmatmul.mubr.msk.f32.gmra.mrb[2].mxu0 %vm280_vm0, %v4748_v28  ;;  %v1719_v28 = vld [vmem:[#allocation9 + $0x28] sm:$0xff] }
  0xfb   : > { %3712 = vmatprep.mubr.msk.f32.mxu0 %vm280_vm0, %v4750_v29  ;;  %3989 = vmatpush3.bf16.msra.mxu0 %v3986_v40  ;;  %v3990_v29 = vpack.c.bf16 %v1719_v28, %v1718_v26  ;;  %v2139_v40 = vld [vmem:[#allocation9 + $0x60] sm:$0xff] }
  0xfd   : > { %3991 = vmatprep.subr.bf16.mxu1 %v3990_v29 }
  0xfe   : > { %3713 = vmatmul.mubr.msk.f32.gmra.mrb[4].mxu0 %vm280_vm0, %v4761_v31  ;;  %3993 = vmatpush3.bf16.msra.mxu1 %v3990_v29  ;;  %v1720_v31 = vld [vmem:[#allocation9 + $0x30] sm:$0xff] }
  0xff   : > { %3715 = vmatprep.mubr.msk.f32.mxu0 %vm280_vm0, %v901_v10  ;;  %v3994_v42 = vpack.c.bf16 %v1721_v41, %v1720_v31  ;;  %v1989_v10 = vld [vmem:[#allocation9 + $0x40] sm:$0xff] }
 0x100   : > { %v4006_v23 = vpack.c.bf16 %v1990_v16, %v1989_v10  ;;  %v2740_v16 = vld [vmem:[#allocation9 + $0xe0] sm:$0xff] }
 0x101   : > { %3995 = vmatprep.subr.bf16.mxu1 %v3994_v42 }
 0x102   : > { %3716 = vmatmul.mubr.msk.f32.gmra.mrb[6].mxu0 %vm280_vm0, %v1352_v22  ;;  %3997 = vmatpush3.bf16.msra.mxu1 %v3994_v42  ;;  %v2140_v22 = vld [vmem:[#allocation9 + $0x68] sm:$0xff] }
 0x103   : > { %3726 = vmatprep.mubr.msk.f32.mxu0 %vm280_vm0, %v4792_v50  ;;  %3999 = vmatprep.subr.bf16.mxu1 %v3998_v46  ;;  %v4014_v26 = vpack.c.bf16 %v2140_v22, %v2139_v40  ;;  %v1980_v42 = vld [vmem:[#allocation3 + $0x2] sm:$0xff]  ;;  %v2588_v40 = vld [vmem:[#allocation3 + $0x90] sm:$0xff] }
 0x104   : > { %v2892_v22 = vld [vmem:[#allocation9 + $0x110] sm:$0xff] }
 0x106   : > { %3727 = vmatmul.mubr.msk.f32.vlgmr.msra.gmra.mrb[0].mxu0 %vm280_vm0, %v4797_v54 }
 0x107   : > { %3729 = vmatprep.mubr.msk.f32.mxu0 %vm280_vm0, %v4799_v55 }
 0x10a   : > { %3730 = vmatmul.mubr.msk.f32.gmra.mrb[2].mxu0 %vm280_vm0, %v4805_v57 }
 0x10b   : > { %3732 = vmatprep.mubr.msk.f32.mxu0 %vm280_vm0, %v4807_v58 }
 0x10e   : > { %3733 = vmatmul.mubr.msk.f32.gmra.mrb[4].mxu0 %vm280_vm0, %v4813_v59 }
 0x10f   : > { %3735 = vmatprep.mubr.msk.f32.mxu0 %vm280_vm0, %v1051_v24 }
 0x112   : > { %3736 = vmatmul.mubr.msk.f32.gmra.mrb[6].mxu0 %vm280_vm0, %v1502_v25 }
 0x1d9   : > { %v3728_v48 = vpop.f32.mrb[0].mxu0 }
 0x1da   : > { %v1653_v49 = vadd.f32 %v3728_v48, %v3261_v47  ;;  %v1598_v50 = vpop.f32.mrb[1].mxu0  ;;  %v2289_v48 = vld [vmem:[#allocation9 + $0x80] sm:$0xff] }
 0x1db   : > { %v1652_v51 = vadd.f32 %v3261_v47, %v1598_v50 }
 0x1dc   : > { %v1661_v52 = vmax.f32 %v1653_v49, 0.0  ;;  %v2290_v49 = vld [vmem:[#allocation9 + $0x88] sm:$0xff] }
 0x1dd   : > { %v1660_v53 = vmax.f32 %v1652_v51, 0.0  ;;  %v3731_v54 = vpop.f32.mrb[2].mxu0  ;;  %v4022_v51 = vpack.c.bf16 %v2290_v49, %v2289_v48 }
 0x1de   : > { %1690 = vst.msk [vmem:[#allocation3 + $0x21] sm:$0xff] %vm280_vm0, %v1661_v52  ;;  %v1655_v55 = vadd.f32 %v3731_v54, %v3261_v47  ;;  %v1608_v56 = vpop.f32.mrb[3].mxu0 }
 0x1df   : > { %1689 = vst.msk [vmem:[#allocation3 + $0x11] sm:$0xff] %vm280_vm0, %v1660_v53  ;;  %v1654_v57 = vadd.f32 %v3261_v47, %v1608_v56 }
 0x1e0   : > { %v1663_v58 = vmax.f32 %v1655_v55, 0.0 }
 0x1e1   : > { %v1662_v59 = vmax.f32 %v1654_v57, 0.0  ;;  %v3734_v60 = vpop.f32.mrb[4].mxu0  ;;  %v2291_v57 = vld [vmem:[#allocation9 + $0x90] sm:$0xff] }
 0x1e2   : > { %1692 = vst.msk [vmem:[#allocation3 + $0x41] sm:$0xff] %vm280_vm0, %v1663_v58  ;;  %v1657_v61 = vadd.f32 %v3734_v60, %v3261_v47  ;;  %v1618_v62 = vpop.f32.mrb[5].mxu0  ;;  %v2292_v58 = vld [vmem:[#allocation9 + $0x98] sm:$0xff]  ;;  %v2439_v60 = vld [vmem:[#allocation9 + $0xa0] sm:$0xff] }
 0x1e3   : > { %1691 = vst.msk [vmem:[#allocation3 + $0x31] sm:$0xff] %vm280_vm0, %v1662_v59  ;;  %v1656_v1 = vadd.f32 %v3261_v47, %v1618_v62  ;;  %v4026_v59 = vpack.c.bf16 %v2292_v58, %v2291_v57 }
 0x1e4   : > { %v1665_v2 = vmax.f32 %v1657_v61, 0.0  ;;  %v2440_v61 = vld [vmem:[#allocation9 + $0xa8] sm:$0xff] }
 0x1e5   : > { %v1664_v3 = vmax.f32 %v1656_v1, 0.0  ;;  %v3737_v4 = vpop.f32.mrb[6].mxu0  ;;  %v4916_v19 = vld [vmem:[#allocation3 + $0x21] sm:$0xff]  ;;  %v4030_v62 = vpack.c.bf16 %v2440_v61, %v2439_v60  ;;  %v2442_v1 = vld [vmem:[#allocation9 + $0xb8] sm:$0xff] }
 0x1e6   : > { %1694 = vst.msk [vmem:[#allocation3 + $0x61] sm:$0xff] %vm280_vm0, %v1665_v2  ;;  %v1659_v6 = vadd.f32 %v3737_v4, %v3261_v47  ;;  %v1628_v8 = vpop.f32.mrb[7].mxu0  ;;  %v4911_v9 = vld [vmem:[#allocation3 + $0x11] sm:$0xff]  ;;  %v4944_v25 = vld [vmem:[#allocation3 + $0x20] sm:$0xff]  ;;  %v4034_v2 = vpack.c.bf16 %v2442_v1, %v2441_v0  ;;  %v2591_v4 = vld [vmem:[#allocation9 + $0xc8] sm:$0xff] }
 0x1e7   : > { %1693 = vst.msk [vmem:[#allocation3 + $0x51] sm:$0xff] %vm280_vm0, %v1664_v3  ;;  %v1658_v18 = vadd.f32 %v3261_v47, %v1628_v8  ;;  %3747 = vmatmul.mubr.msk.f32.vlgmr.msra.gmra.mrb[0].mxu1 %vm280_vm0, %v4911_v9  ;;  %v1698_v39 = vld [vmem:[#allocation3 + $0x10] sm:$0xff]  ;;  %v4970_v50 = vld [vmem:[#allocation3 + $0x22] sm:$0xff] }
 0x1e8   : > { %v1667_v20 = vmax.f32 %v1659_v6, 0.0  ;;  %3749 = vmatprep.mubr.msk.f32.mxu1 %vm280_vm0, %v4916_v19  ;;  %4001 = vmatpush3.bf16.msra.mxu1 %v3998_v46  ;;  %v4018_v46 = vpack.c.bf16 %v2142_v45, %v2141_v44  ;;  %v1981_v47 = vld [vmem:[#allocation3 + $0x12] sm:$0xff]  ;;  %v2590_v3 = vld [vmem:[#allocation9 + $0xc0] sm:$0xff] }
 0x1e9   : > { %v1666_v21 = vmax.f32 %v1658_v18, 0.0  ;;  %4003 = vmatprep.subr.bf16.mxu1 %v4002_v5  ;;  %v4926_v27 = vld [vmem:[#allocation3 + $0x41] sm:$0xff]  ;;  %v2592_v8 = vld [vmem:[#allocation9 + $0xd0] sm:$0xff] }
 0x1ea   : > { %1696 = vst.msk [vmem:[#allocation3 + $0x81] sm:$0xff] %vm280_vm0, %v1667_v20  ;;  %v4921_v24 = vld [vmem:[#allocation3 + $0x31] sm:$0xff]  ;;  %v4952_v29 = vld [vmem:[#allocation3 + $0x40] sm:$0xff]  ;;  %v2741_v18 = vld [vmem:[#allocation9 + $0xe8] sm:$0xff] }
 0x1eb   : > { %1695 = vst.msk [vmem:[#allocation3 + $0x71] sm:$0xff] %vm280_vm0, %v1666_v21  ;;  %3750 = vmatmul.mubr.msk.f32.gmra.mrb[2].mxu1 %vm280_vm0, %v4921_v24  ;;  %v4948_v28 = vld [vmem:[#allocation3 + $0x30] sm:$0xff]  ;;  %v4978_v53 = vld [vmem:[#allocation3 + $0x42] sm:$0xff]  ;;  %v4046_v20 = vpack.c.bf16 %v2741_v18, %v2740_v16 }
 0x1ec   : > { %3752 = vmatprep.mubr.msk.f32.mxu1 %vm280_vm0, %v4926_v27  ;;  %4005 = vmatpush3.bf16.msra.mxu1 %v4002_v5  ;;  %v4974_v52 = vld [vmem:[#allocation3 + $0x32] sm:$0xff]  ;;  %v4038_v5 = vpack.c.bf16 %v2591_v4, %v2590_v3 }
 0x1ed   : > { %4007 = vmatprep.subr.bf16.mxu1 %v4006_v23  ;;  %v4934_v33 = vld [vmem:[#allocation3 + $0x61] sm:$0xff] }
 0x1ee   : > { %v4930_v32 = vld [vmem:[#allocation3 + $0x51] sm:$0xff]  ;;  %v4960_v41 = vld [vmem:[#allocation3 + $0x60] sm:$0xff] }
 0x1ef   : > { %3753 = vmatmul.mubr.msk.f32.gmra.mrb[4].mxu1 %vm280_vm0, %v4930_v32  ;;  %v4956_v31 = vld [vmem:[#allocation3 + $0x50] sm:$0xff]  ;;  %v4986_v55 = vld [vmem:[#allocation3 + $0x62] sm:$0xff] }
 0x1f0   : > { %3755 = vmatprep.mubr.msk.f32.mxu1 %vm280_vm0, %v4934_v33  ;;  %v4982_v54 = vld [vmem:[#allocation3 + $0x52] sm:$0xff] }
 0x1f1   : > { %v2137_v63 = vld [vmem:[#allocation3 + $0x80] sm:$0xff] }
 0x1f2   : > { %v4938_v35 = vld [vmem:[#allocation3 + $0x71] sm:$0xff]  ;;  %v2287_v6 = vld [vmem:[#allocation3 + $0x81] sm:$0xff] }
 0x1f3   : > { %3756 = vmatmul.mubr.msk.f32.gmra.mrb[6].mxu1 %vm280_vm0, %v4938_v35  ;;  %v4964_v43 = vld [vmem:[#allocation3 + $0x70] sm:$0xff]  ;;  %v2437_v21 = vld [vmem:[#allocation3 + $0x82] sm:$0xff] }
 0x1f4   : > { %3766 = vmatprep.mubr.msk.f32.mxu1 %vm280_vm0, %v1697_v34  ;;  %v4990_v56 = vld [vmem:[#allocation3 + $0x72] sm:$0xff] }
 0x1f5   : > { %v2743_v34 = vld [vmem:[#allocation9 + $0xf8] sm:$0xff] }
 0x1f7   : > { %3767 = vmatmul.mubr.msk.f32.vlgmr.msra.gmra.mrb[0].mxu1 %vm280_vm0, %v1698_v39 }
 0x1f8   : > { %3769 = vmatprep.mubr.msk.f32.mxu1 %vm280_vm0, %v4944_v25  ;;  %4009 = vmatpush3.bf16.msra.mxu1 %v4006_v23  ;;  %v2742_v23 = vld [vmem:[#allocation9 + $0xf0] sm:$0xff] }
 0x1f9   : > { %4011 = vmatprep.subr.bf16.mxu1 %v4010_v38  ;;  %v4050_v37 = vpack.c.bf16 %v2743_v34, %v2742_v23 }
 0x1fb   : > { %3770 = vmatmul.mubr.msk.f32.gmra.mrb[2].mxu1 %vm280_vm0, %v4948_v28 }
 0x1fc   : > { %3772 = vmatprep.mubr.msk.f32.mxu1 %vm280_vm0, %v4952_v29  ;;  %4013 = vmatpush3.bf16.msra.mxu1 %v4010_v38  ;;  %v2891_v38 = vld [vmem:[#allocation9 + $0x108] sm:$0xff] }
 0x1fd   : > { %4015 = vmatprep.subr.bf16.mxu1 %v4014_v26 }
 0x1ff   : > { %3773 = vmatmul.mubr.msk.f32.gmra.mrb[4].mxu1 %vm280_vm0, %v4956_v31 }
 0x200   : > { %3775 = vmatprep.mubr.msk.f32.mxu1 %vm280_vm0, %v4960_v41 }
 0x203   : > { %3776 = vmatmul.mubr.msk.f32.gmra.mrb[6].mxu1 %vm280_vm0, %v4964_v43 }
 0x204   : > { %3786 = vmatprep.mubr.msk.f32.mxu1 %vm280_vm0, %v1980_v42 }
 0x207   : > { %3787 = vmatmul.mubr.msk.f32.vlgmr.msra.gmra.mrb[0].mxu1 %vm280_vm0, %v1981_v47 }
 0x208   : > { %3789 = vmatprep.mubr.msk.f32.mxu1 %vm280_vm0, %v4970_v50  ;;  %4017 = vmatpush3.bf16.msra.mxu1 %v4014_v26 }
 0x209   : > { %4019 = vmatprep.subr.bf16.mxu1 %v4018_v46 }
 0x20b   : > { %3790 = vmatmul.mubr.msk.f32.gmra.mrb[2].mxu1 %vm280_vm0, %v4974_v52 }
 0x20c   : > { %3792 = vmatprep.mubr.msk.f32.mxu1 %vm280_vm0, %v4978_v53  ;;  %4021 = vmatpush3.bf16.msra.mxu1 %v4018_v46 }
 0x20d   : > { %4023 = vmatprep.subr.bf16.mxu1 %v4022_v51 }
 0x20f   : > { %3793 = vmatmul.mubr.msk.f32.gmra.mrb[4].mxu1 %vm280_vm0, %v4982_v54 }
 0x210   : > { %3795 = vmatprep.mubr.msk.f32.mxu1 %vm280_vm0, %v4986_v55 }
 0x213   : > { %3796 = vmatmul.mubr.msk.f32.gmra.mrb[6].mxu1 %vm280_vm0, %v4990_v56 }
 0x214   : > { %3806 = vmatprep.mubr.msk.f32.mxu1 %vm280_vm0, %v1698_v39  ;;  %v4054_v39 = vpack.c.bf16 %v2891_v38, %v2890_v36 }
 0x217   : > { %3807 = vmatmul.mubr.msk.f32.vlgmr.msra.gmra.mrb[0].mxu1 %vm280_vm0, %v4944_v25 }
 0x218   : > { %3809 = vmatprep.mubr.msk.f32.mxu1 %vm280_vm0, %v4948_v28  ;;  %4025 = vmatpush3.bf16.msra.mxu1 %v4022_v51 }
 0x219   : > { %4027 = vmatprep.subr.bf16.mxu1 %v4026_v59 }
 0x21b   : > { %3810 = vmatmul.mubr.msk.f32.gmra.mrb[2].mxu1 %vm280_vm0, %v4952_v29 }
 0x21c   : > { %3812 = vmatprep.mubr.msk.f32.mxu1 %vm280_vm0, %v4956_v31  ;;  %4029 = vmatpush3.bf16.msra.mxu1 %v4026_v59 }
 0x21d   : > { %4031 = vmatprep.subr.bf16.mxu1 %v4030_v62 }
 0x21f   : > { %3813 = vmatmul.mubr.msk.f32.gmra.mrb[4].mxu1 %vm280_vm0, %v4960_v41 }
 0x220   : > { %3815 = vmatprep.mubr.msk.f32.mxu1 %vm280_vm0, %v4964_v43 }
 0x223   : > { %3816 = vmatmul.mubr.msk.f32.gmra.mrb[6].mxu1 %vm280_vm0, %v2137_v63 }
 0x224   : > { %3826 = vmatprep.mubr.msk.f32.mxu1 %vm280_vm0, %v4911_v9  ;;  %v2593_v9 = vld [vmem:[#allocation9 + $0xd8] sm:$0xff] }
 0x225   : > { %v4042_v10 = vpack.c.bf16 %v2593_v9, %v2592_v8 }
 0x227   : > { %3827 = vmatmul.mubr.msk.f32.vlgmr.msra.gmra.mrb[0].mxu1 %vm280_vm0, %v4916_v19 }
 0x228   : > { %3829 = vmatprep.mubr.msk.f32.mxu1 %vm280_vm0, %v4921_v24  ;;  %4033 = vmatpush3.bf16.msra.mxu1 %v4030_v62 }
 0x229   : > { %4035 = vmatprep.subr.bf16.mxu1 %v4034_v2 }
 0x22b   : > { %3830 = vmatmul.mubr.msk.f32.gmra.mrb[2].mxu1 %vm280_vm0, %v4926_v27 }
 0x22c   : > { %3832 = vmatprep.mubr.msk.f32.mxu1 %vm280_vm0, %v4930_v32  ;;  %4037 = vmatpush3.bf16.msra.mxu1 %v4034_v2 }
 0x22d   : > { %4039 = vmatprep.subr.bf16.mxu1 %v4038_v5 }
 0x22f   : > { %3833 = vmatmul.mubr.msk.f32.gmra.mrb[4].mxu1 %vm280_vm0, %v4934_v33 }
 0x230   : > { %3835 = vmatprep.mubr.msk.f32.mxu1 %vm280_vm0, %v4938_v35 }
 0x233   : > { %3836 = vmatmul.mubr.msk.f32.gmra.mrb[6].mxu1 %vm280_vm0, %v2287_v6 }
 0x234   : > { %3846 = vmatprep.mubr.msk.f32.mxu1 %vm280_vm0, %v1981_v47 }
 0x237   : > { %3847 = vmatmul.mubr.msk.f32.vlgmr.msra.gmra.mrb[0].mxu1 %vm280_vm0, %v4970_v50 }
 0x238   : > { %3849 = vmatprep.mubr.msk.f32.mxu1 %vm280_vm0, %v4974_v52  ;;  %4041 = vmatpush3.bf16.msra.mxu1 %v4038_v5 }
 0x239   : > { %4043 = vmatprep.subr.bf16.mxu1 %v4042_v10 }
 0x23b   : > { %3850 = vmatmul.mubr.msk.f32.gmra.mrb[2].mxu1 %vm280_vm0, %v4978_v53 }
 0x23c   : > { %3852 = vmatprep.mubr.msk.f32.mxu1 %vm280_vm0, %v4982_v54  ;;  %4045 = vmatpush3.bf16.msra.mxu1 %v4042_v10 }
 0x23d   : > { %4047 = vmatprep.subr.bf16.mxu1 %v4046_v20 }
 0x23f   : > { %3853 = vmatmul.mubr.msk.f32.gmra.mrb[4].mxu1 %vm280_vm0, %v4986_v55 }
 0x240   : > { %3855 = vmatprep.mubr.msk.f32.mxu1 %vm280_vm0, %v4990_v56 }
 0x243   : > { %3856 = vmatmul.mubr.msk.f32.gmra.mrb[6].mxu1 %vm280_vm0, %v2437_v21 }
 0x244   : > { %3866 = vmatprep.mubr.msk.f32.mxu1 %vm280_vm0, %v4944_v25  ;;  %v2893_v25 = vld [vmem:[#allocation9 + $0x118] sm:$0xff] }
 0x245   : > { %v4058_v26 = vpack.c.bf16 %v2893_v25, %v2892_v22 }
 0x247   : > { %3867 = vmatmul.mubr.msk.f32.vlgmr.msra.gmra.mrb[0].mxu1 %vm280_vm0, %v4948_v28 }
 0x248   : > { %3869 = vmatprep.mubr.msk.f32.mxu1 %vm280_vm0, %v4952_v29  ;;  %4049 = vmatpush3.bf16.msra.mxu1 %v4046_v20 }
 0x249   : > { %4051 = vmatprep.subr.bf16.mxu1 %v4050_v37 }
 0x24b   : > { %3870 = vmatmul.mubr.msk.f32.gmra.mrb[2].mxu1 %vm280_vm0, %v4956_v31 }
 0x24c   : > { %3872 = vmatprep.mubr.msk.f32.mxu1 %vm280_vm0, %v4960_v41  ;;  %4053 = vmatpush3.bf16.msra.mxu1 %v4050_v37 }
 0x24d   : > { %4055 = vmatprep.subr.bf16.mxu1 %v4054_v39 }
 0x24f   : > { %3873 = vmatmul.mubr.msk.f32.gmra.mrb[4].mxu1 %vm280_vm0, %v4964_v43 }
 0x250   : > { %3875 = vmatprep.mubr.msk.f32.mxu1 %vm280_vm0, %v2137_v63 }
 0x253   : > { %3876 = vmatmul.mubr.msk.f32.gmra.mrb[6].mxu1 %vm280_vm0, %v2588_v40 }
 0x254   : > { %3886 = vmatprep.mubr.msk.f32.mxu1 %vm280_vm0, %v4916_v19  ;;  %v2738_v19 = vld [vmem:[#allocation3 + $0x91] sm:$0xff] }
 0x257   : > { %3887 = vmatmul.mubr.msk.f32.vlgmr.msra.gmra.mrb[0].mxu1 %vm280_vm0, %v4921_v24  ;;  %v2888_v24 = vld [vmem:[#allocation3 + $0x92] sm:$0xff] }
 0x258   : > { %3889 = vmatprep.mubr.msk.f32.mxu1 %vm280_vm0, %v4926_v27  ;;  %4057 = vmatpush3.bf16.msra.mxu1 %v4054_v39  ;;  %v3334_v27 = vld [vmem:[%s5165_s4] ss:$0 sm:$0xff] }
 0x259   : > { %4059 = vmatprep.subr.bf16.mxu1 %v4058_v26 }
 0x25b   : > { %3890 = vmatmul.mubr.msk.f32.gmra.mrb[2].mxu1 %vm280_vm0, %v4930_v32 }
 0x25c   : > { %3892 = vmatprep.mubr.msk.f32.mxu1 %vm280_vm0, %v4934_v33  ;;  %4061 = vmatpush3.bf16.msra.mxu1 %v4058_v26 }
 0x25f   : > { %3893 = vmatmul.mubr.msk.f32.gmra.mrb[4].mxu1 %vm280_vm0, %v4938_v35 }
 0x260   : > { %3895 = vmatprep.mubr.msk.f32.mxu1 %vm280_vm0, %v2287_v6 }
 0x263   : > { %3896 = vmatmul.mubr.msk.f32.gmra.mrb[6].mxu1 %vm280_vm0, %v2738_v19 }
 0x264   : > { %3906 = vmatprep.mubr.msk.f32.mxu1 %vm280_vm0, %v4970_v50 }
 0x267   : > { %3907 = vmatmul.mubr.msk.f32.vlgmr.msra.gmra.mrb[0].mxu1 %vm280_vm0, %v4974_v52 }
 0x268   : > { %3909 = vmatprep.mubr.msk.f32.mxu1 %vm280_vm0, %v4978_v53 }
 0x26b   : > { %3910 = vmatmul.mubr.msk.f32.gmra.mrb[2].mxu1 %vm280_vm0, %v4982_v54 }
 0x26c   : > { %3912 = vmatprep.mubr.msk.f32.mxu1 %vm280_vm0, %v4986_v55 }
 0x26f   : > { %3913 = vmatmul.mubr.msk.f32.gmra.mrb[4].mxu1 %vm280_vm0, %v4990_v56 }
 0x270   : > { %3915 = vmatprep.mubr.msk.f32.mxu1 %vm280_vm0, %v2437_v21 }
 0x273   : > { %3916 = vmatmul.mubr.msk.f32.gmra.mrb[6].mxu1 %vm280_vm0, %v2888_v24 }
 0x33a   : > { %v3908_v32 = vpop.f32.mrb[0].mxu1 }
 0x33b   : > { %v3039_v33 = vadd.f32 %v3908_v32, %v3334_v27  ;;  %v2984_v35 = vpop.f32.mrb[1].mxu1 }
 0x33c   : > { %v3038_v28 = vadd.f32 %v3334_v27, %v2984_v35 }
 0x33d   : > { %v3047_v29 = vadd.f32 %v3039_v33, %v4703_v11 }
 0x33e   : > { %v3046_v31 = vadd.f32 %v3038_v28, %v4697_v7  ;;  %v3911_v41 = vpop.f32.mrb[2].mxu1 }
 0x33f   : > { %v3055_v42 = vmax.f32 %v3047_v29, 0.0  ;;  %v3041_v43 = vadd.f32 %v3911_v41, %v3334_v27  ;;  %v2994_v44 = vpop.f32.mrb[3].mxu1 }
 0x340   : > { %v3054_v45 = vmax.f32 %v3046_v31, 0.0  ;;  %v3040_v46 = vadd.f32 %v3334_v27, %v2994_v44 }
 0x341   : > { %3063 = vst.msk [vmem:[%s5086_s10 + $0x8] sm:$0xff] %vm280_vm0, %v3055_v42  ;;  %v3049_v47 = vadd.f32 %v3041_v43, %v4711_v13 }
 0x342   : > { %3062 = vst.msk [vmem:[%s5086_s10] sm:$0xff] %vm280_vm0, %v3054_v45  ;;  %v3048_v7 = vadd.f32 %v3040_v46, %v4708_v12  ;;  %v3914_v11 = vpop.f32.mrb[4].mxu1 }
 0x343   : > { %v3057_v48 = vmax.f32 %v3049_v47, 0.0  ;;  %v3043_v49 = vadd.f32 %v3914_v11, %v3334_v27  ;;  %v3004_v50 = vpop.f32.mrb[5].mxu1 }
 0x344   : > { %v3056_v51 = vmax.f32 %v3048_v7, 0.0  ;;  %v3042_v52 = vadd.f32 %v3334_v27, %v3004_v50 }
 0x345   : > { %3065 = vst.msk [vmem:[%s5086_s10 + $0x18] sm:$0xff] %vm280_vm0, %v3057_v48  ;;  %v3051_v53 = vadd.f32 %v3043_v49, %v4723_v15 }
 0x346   : > { %3064 = vst.msk [vmem:[%s5086_s10 + $0x10] sm:$0xff] %vm280_vm0, %v3056_v51  ;;  %v3050_v13 = vadd.f32 %v3042_v52, %v4714_v14  ;;  %v3917_v54 = vpop.f32.mrb[6].mxu1 }
 0x347   : > { %v3059_v12 = vmax.f32 %v3051_v53, 0.0  ;;  %v3045_v55 = vadd.f32 %v3917_v54, %v3334_v27  ;;  %v3014_v56 = vpop.f32.mrb[7].mxu1 }
 0x348   : > { %v3058_v57 = vmax.f32 %v3050_v13, 0.0  ;;  %v3044_v58 = vadd.f32 %v3334_v27, %v3014_v56 }
 0x349   : > { %3067 = vst.msk [vmem:[%s5086_s10 + $0x28] sm:$0xff] %vm280_vm0, %v3059_v12  ;;  %v3053_v15 = vadd.f32 %v3045_v55, %v4753_v30 }
 0x34a   : > { %3066 = vst.msk [vmem:[%s5086_s10 + $0x20] sm:$0xff] %vm280_vm0, %v3058_v57  ;;  %v3052_v14 = vadd.f32 %v3044_v58, %v4728_v17 }
 0x34b   : > { %v3061_v59 = vmax.f32 %v3053_v15, 0.0 }
 0x34c   : > { %v3060_v60 = vmax.f32 %v3052_v14, 0.0 }
 0x34d   : > { %3069 = vst.msk [vmem:[%s5086_s10 + $0x38] sm:$0xff] %vm280_vm0, %v3061_v59 }
 0x34e   : > { %3068 = vst.msk [vmem:[%s5086_s10 + $0x30] sm:$0xff] %vm280_vm0, %v3060_v60 }
 0x34f   : > { %4361 = shalt.err (!%p4358_p1)
}
 0x350   : > { %s4362_s12 = scalar_lea.hbm %s5111_s11, 1024  ;;  %s4366_s15 = scalar_lea.hbm %s5166_s5, 2048 }
 0x351   : > { %p4363_p13 = scmp.ne.s32.totalorder %s5111_s11, %s4362_s12  ;;  %p4367_p4 = scmp.lt.u32.totalorder %s5111_s11, %s5166_s5 }
 0x352   : > { %p4368_p5 = scmp.lt.u32.totalorder %s4366_s15, %s4362_s12  ;;  %p4370_p11 = scmp.lt.u32.totalorder %s4362_s12, %s5111_s11 }
 0x353   : > { %p4364_p6 = pnand %p4363_p13, %p5180_p0 }
 0x354   : > { %p4369_p8 = por %p4368_p5, %p4367_p4 }
 0x355   : > { %p4365_p10 = pneg %p4364_p6 }
 0x356   : > { %p4371_p2 = por %p4370_p11, %p4369_p8 }
 0x358   : > { %p4372_p3 = pnand %p4371_p2, %p4365_p10 }
 0x35a   : > { %4375 = shalt.err (!%p4372_p3)
}
 0x35b   : > { %s4427_s28 = smov 128   ;;  %s4428_s9 = smov 8  }
 0x35c   : > { %4200 = dma.vmem_to_hbm [thread:$0]  (%p5180_p0), %s5113_s13, 1024, %s5111_s11, %s3071_s22, %s4427_s28, %s4427_s28, %s4428_s9  }
 0x35d PF: > { %s3099_s30 = sand.u32 1, %s4406_s18   ;;  %p5181_p7 = scmp.ne.s32.totalorder %s5171_s25, 0 }
 0x35e   : > { %p5182_p9 = scmp.ge.s32.totalorder %s4418_s21, 2  ;;  %s3100_s17 = scalar_lea.sflag [#allocation6], %s3099_s30 }
 0x360   : > { %p4214_p12 = pnand %p5182_p9, %p5181_p7 }
 0x362   : > { %4401 = dma.done.wait (!%p4214_p12), %s3100_s17, 1024  }
 0x363   : > { %4403 = vsyncadd (!%p4214_p12), %s3100_s17, 4294966272  ;;  %p19_p1 = scmp.ge.s32.totalorder %s4575_s29, 4   ;;  %s5183_s18 = smov %s4410_s19 }
 0x364   : > { %s5184_s19 = smov %s4414_s20  ;;  %s5185_s20 = smov %s4591_s27 }
 0x365   : > { %s5186_s21 = smov %s4575_s29  ;;  %21 = sbr.rel (!%p19_p1) target bundleno = 6 (0x6), region = 113 }
 0x36c   :  { %3105 = vsyncpa [#allocation5], 1 }
 0x36d   :  { %3107 = vsyncpa [#allocation5 + $0x1], 1 }
 0x36e   :  { %3108 = vsyncpa [#allocation8], 1 }
 0x36f   :  { %3109 = vsyncpa [#allocation6], 1 }
 0x370   :  { %3111 = vsyncpa [#allocation6 + $0x1], 1 }

</bundles_post_ra>
